<compile_context>
chip_gen: v7x
topology: tpu7x:2x2x1
jax: 0.10.0
libtpu: 0.0.40
codegen_flags: <defaults>
</compile_context>

<pallas_src>
import jax
import jax.numpy as jnp
from jax.experimental import pallas as pl
from jax.experimental.pallas import tpu as pltpu

# ---------------- model hyper-parameters (small, synthetic) ----------------
BATCH = 4         # total batch
B_BLK = 2         # samples folded into one grid step (M = B_BLK * TOKENS)
IMG = 16          # input resolution
PATCH = 8         # patch size  -> grid 2x2 -> 4 patches
CHANS = 3
WIDTH = 32        # transformer width D
LAYERS = 2
HEADS = 4
HEAD_DIM = WIDTH // HEADS
EMBED = 32        # visual projection output dim (== aes_fc input dim)
OUT_LEN = 10      # aes_fc output (fc_bias=False)
OUT_PAD = 128     # lane-dense padded output width (sliced back to OUT_LEN)
PGRID = IMG // PATCH
NPATCH = PGRID * PGRID
TOKENS = NPATCH + 1
M_ROWS = B_BLK * TOKENS          # matmul M dimension per grid step
PATCH_DIM = CHANS * PATCH * PATCH
MLP_DIM = 4 * WIDTH
LN_EPS = 1e-5

MXU_DT = jnp.bfloat16   # matmul operand dtype (f32 accumulation on the MXU)
ACC_DT = jnp.float32    # accumulation / elementwise dtype


# ------------------------------ fused kernel ------------------------------
def _layernorm(x, g, b):
    x = x.astype(jnp.float32)
    mu = jnp.mean(x, axis=-1, keepdims=True)
    var = jnp.mean(jnp.square(x - mu), axis=-1, keepdims=True)
    return (x - mu) * jax.lax.rsqrt(var + LN_EPS) * g + b


def _fused_clip_kernel(
    patches_ref,                       # [1, M, PATCH_DIM]  (zero row per sample = cls slot)
    mask_ref,                          # [M, M]  block-diagonal additive mask (0 / -1e30)
    conv_w_ref,                        # [PATCH_DIM, WIDTH]            bf16
    cls_pos_ref,                       # [M, WIDTH]  pos_emb (+cls on row 0), tiled B_BLK x
    ln_pre_g_ref, ln_pre_b_ref,        # [1, WIDTH]
    ln1_g_ref, ln1_b_ref,              # [1, 1, WIDTH]   (layer block)
    qw_ref, qb_ref,                    # [1, WIDTH, WIDTH] bf16 (scale folded), [1, 1, WIDTH]
    kw_ref, kb_ref,                    # [1, WIDTH, WIDTH] bf16, [1, 1, WIDTH]
    vw_ref, vb_ref,                    # [1, WIDTH, WIDTH] bf16, [1, 1, WIDTH]
    ow_ref, ob_ref,                    # [1, WIDTH, WIDTH] bf16 (unsplit), [1, 1, WIDTH]
    ln2_g_ref, ln2_b_ref,              # [1, 1, WIDTH]
    w1_ref, b1_ref,                    # [1, WIDTH, MLP_DIM] bf16, [1, 1, MLP_DIM]
    w2_ref, b2_ref,                    # [1, MLP_DIM, WIDTH] bf16, [1, 1, WIDTH]
    ln_post_g_ref, ln_post_b_ref,      # [1, WIDTH]
    proj_ref,                          # [WIDTH, EMBED]                bf16
    aes_w_ref,                         # [EMBED, OUT_PAD]              bf16 (zero-padded cols)
    out_ref,                           # [1, B_BLK, OUT_PAD]
    h_ref,                             # VMEM scratch [M, WIDTH] f32 (residual stream)
    ctx_ref,                           # VMEM scratch [M, WIDTH] f32 (per-head ctx assembly)
):
    layer = pl.program_id(1)

    # --- layer 0: patch-embed matmul (no bias) + class/pos emb + ln_pre ---
    @pl.when(layer == 0)
    def _():
        px = patches_ref[0].astype(MXU_DT)                          # [M, PD]
        tok = jnp.dot(px, conv_w_ref[...],
                      preferred_element_type=ACC_DT)                # cls rows stay 0
        h_ref[...] = _layernorm(tok + cls_pos_ref[...],
                                ln_pre_g_ref[...], ln_pre_b_ref[...])

    h = h_ref[...]                                                  # [M, D] f32

    # --- multi-head self-attention (batch folded into M, block-diag mask) ---
    y = _layernorm(h, ln1_g_ref[0], ln1_b_ref[0]).astype(MXU_DT)
    q = jnp.dot(y, qw_ref[0], preferred_element_type=ACC_DT) + qb_ref[0]   # scale pre-folded
    k = jnp.dot(y, kw_ref[0], preferred_element_type=ACC_DT) + kb_ref[0]
    v = jnp.dot(y, vw_ref[0], preferred_element_type=ACC_DT) + vb_ref[0]
    neg = mask_ref[...]                                             # [M, M]

    for hh in range(HEADS):
        lo = hh * HEAD_DIM
        hi = lo + HEAD_DIM
        qh = q[:, lo:hi].astype(MXU_DT)                             # [M, hd]
        kh = k[:, lo:hi].astype(MXU_DT)
        vh = v[:, lo:hi].astype(MXU_DT)
        s = jax.lax.dot_general(qh, kh, (((1,), (1,)), ((), ())),
                                preferred_element_type=ACC_DT) + neg       # [M, M]
        s = s - jnp.max(s, axis=-1, keepdims=True)
        e = jnp.exp(s)
        p = e * pl.reciprocal(jnp.sum(e, axis=-1, keepdims=True), approx=True)
        # assemble per-head context at static lane offsets (no concat / per-head out-proj)
        ctx_ref[:, lo:hi] = jnp.dot(p.astype(MXU_DT), vh,
                                    preferred_element_type=ACC_DT)          # [M, hd]

    attn = jnp.dot(ctx_ref[...].astype(MXU_DT), ow_ref[0],
                   preferred_element_type=ACC_DT) + ob_ref[0]               # one [M,D]@[D,D]
    h = h + attn                                                            # residual

    # --- MLP with QuickGELU ---
    y2 = _layernorm(h, ln2_g_ref[0], ln2_b_ref[0]).astype(MXU_DT)
    m = jnp.dot(y2, w1_ref[0], preferred_element_type=ACC_DT) + b1_ref[0]   # [M, 4D]
    m = m * jax.nn.sigmoid(1.702 * m)                                       # QuickGELU (f32)
    m = jnp.dot(m.astype(MXU_DT), w2_ref[0],
                preferred_element_type=ACC_DT) + b2_ref[0]                  # [M, D]
    h = h + m                                                               # residual
    h_ref[...] = h

    # --- last layer: ln_post(cls) -> proj -> (f32) -> aes_fc (lane-dense) ---
    @pl.when(layer == LAYERS - 1)
    def _():
        # gather each sample's cls row (row b*TOKENS) into the first B_BLK rows of ctx_ref
        for b in range(B_BLK):
            ctx_ref[b:b + 1, :] = h[b * TOKENS:b * TOKENS + 1, :]
        cls = _layernorm(ctx_ref[0:B_BLK, :],
                         ln_post_g_ref[...], ln_post_b_ref[...])            # [B_BLK, D]
        feat = jnp.dot(cls.astype(MXU_DT), proj_ref[...],
                       preferred_element_type=ACC_DT)                       # [B_BLK, EMBED]
        out = jnp.dot(feat.astype(MXU_DT), aes_w_ref[...],
                      preferred_element_type=ACC_DT)                        # [B_BLK, OUT_PAD]
        out_ref[0] = out.astype(out_ref.dtype)


# ------------------------------ block specs ------------------------------
def _const_spec(shape):
    """Constant block index across the whole grid (fetched once)."""
    zeros = (0,) * len(shape)
    return pl.BlockSpec(shape, lambda b, l: zeros)
    # TODO(synk): at real sizes, mark with pipeline_mode=pl.Buffered(1) to
    # single-buffer constant-index weights (halves resident VMEM on v7x).


def _layer_spec(tail_shape):
    """Per-layer weight block: index (l, 0, 0) -> prefetch layer l+1 under layer l."""
    return pl.BlockSpec((1,) + tuple(tail_shape), lambda b, l: (l, 0, 0))


# ------------------------------ forward wrapper ------------------------------
def clip4aes_forward(x, params):
    """x: [B, 3, H, W] (NCHW, like PyTorch). Returns [B, OUT_LEN] float32."""
    B, C, H, W_img = x.shape
    assert B % B_BLK == 0, "batch must be divisible by B_BLK"
    nb = B // B_BLK
    gh, gw = H // PATCH, W_img // PATCH
    x = x.astype(jnp.float32)                       # x.type(clip_model.dtype) == f32

    # conv1 as a matmul: extract patches -> [B, gh*gw, C*P*P]; prepend a zero
    # row per sample for the class-token slot (class emb folded into cls_pos).
    p = x.reshape(B, C, gh, PATCH, gw, PATCH)
    p = p.transpose(0, 2, 4, 1, 3, 5).reshape(B, gh * gw, PATCH_DIM)
    p = jnp.concatenate([jnp.zeros((B, 1, PATCH_DIM), jnp.float32), p], axis=1)
    p = p.reshape(nb, M_ROWS, PATCH_DIM)            # batch folded into matmul M

    cls_pos = params["pos_emb"].at[0].add(params["class_emb"])        # [TOKENS, D]
    cls_pos = jnp.tile(cls_pos, (B_BLK, 1))                           # [M, D]

    # block-diagonal additive mask so folded samples never attend across rows
    sample_id = jnp.arange(M_ROWS) // TOKENS
    mask = jnp.where(sample_id[:, None] == sample_id[None, :],
                     0.0, -1e30).astype(jnp.float32)                  # [M, M]

    blocks = params["blocks"]

    def stack(name):
        return jnp.stack([blk[name] for blk in blocks])

    scale = HEAD_DIM ** -0.5
    attn_in_w = stack("attn_in_w")                                    # [L, D, 3D]
    attn_in_b = stack("attn_in_b")                                    # [L, 3D]
    qw = (attn_in_w[:, :, :WIDTH] * scale).astype(MXU_DT)             # scale folded into Q
    kw = attn_in_w[:, :, WIDTH:2 * WIDTH].astype(MXU_DT)
    vw = attn_in_w[:, :, 2 * WIDTH:].astype(MXU_DT)
    qb = (attn_in_b[:, :WIDTH] * scale).reshape(LAYERS, 1, WIDTH)
    kb = attn_in_b[:, WIDTH:2 * WIDTH].reshape(LAYERS, 1, WIDTH)
    vb = attn_in_b[:, 2 * WIDTH:].reshape(LAYERS, 1, WIDTH)

    ln1_g = stack("ln1_g").reshape(LAYERS, 1, WIDTH)
    ln1_b = stack("ln1_b").reshape(LAYERS, 1, WIDTH)
    ow = stack("attn_out_w").astype(MXU_DT)                           # [L, D, D] unsplit
    ob = stack("attn_out_b").reshape(LAYERS, 1, WIDTH)
    ln2_g = stack("ln2_g").reshape(LAYERS, 1, WIDTH)
    ln2_b = stack("ln2_b").reshape(LAYERS, 1, WIDTH)
    w1 = stack("mlp_w1").astype(MXU_DT)                               # [L, D, 4D]
    b1 = stack("mlp_b1").reshape(LAYERS, 1, MLP_DIM)
    w2 = stack("mlp_w2").astype(MXU_DT)                               # [L, 4D, D]
    b2 = stack("mlp_b2").reshape(LAYERS, 1, WIDTH)

    # lane-dense aes_fc: zero-pad output columns to 128, slice in wrapper
    aes_w = jnp.zeros((EMBED, OUT_PAD), jnp.float32)
    aes_w = aes_w.at[:, :OUT_LEN].set(params["aes_fc_w"]).astype(MXU_DT)

    inputs = (
        p, mask,
        params["conv_w"].astype(MXU_DT), cls_pos,
        params["ln_pre_g"].reshape(1, WIDTH), params["ln_pre_b"].reshape(1, WIDTH),
        ln1_g, ln1_b, qw, qb, kw, kb, vw, vb, ow, ob,
        ln2_g, ln2_b, w1, b1, w2, b2,
        params["ln_post_g"].reshape(1, WIDTH), params["ln_post_b"].reshape(1, WIDTH),
        params["proj"].astype(MXU_DT),
        aes_w,
    )

    in_specs = [
        pl.BlockSpec((1, M_ROWS, PATCH_DIM), lambda b, l: (b, 0, 0)),   # patches
        _const_spec((M_ROWS, M_ROWS)),                                  # mask
        _const_spec((PATCH_DIM, WIDTH)),                                # conv_w
        _const_spec((M_ROWS, WIDTH)),                                   # cls_pos
        _const_spec((1, WIDTH)), _const_spec((1, WIDTH)),               # ln_pre g/b
        _layer_spec((1, WIDTH)), _layer_spec((1, WIDTH)),               # ln1 g/b
        _layer_spec((WIDTH, WIDTH)), _layer_spec((1, WIDTH)),           # qw, qb
        _layer_spec((WIDTH, WIDTH)), _layer_spec((1, WIDTH)),           # kw, kb
        _layer_spec((WIDTH, WIDTH)), _layer_spec((1, WIDTH)),           # vw, vb
        _layer_spec((WIDTH, WIDTH)), _layer_spec((1, WIDTH)),           # ow, ob
        _layer_spec((1, WIDTH)), _layer_spec((1, WIDTH)),               # ln2 g/b
        _layer_spec((WIDTH, MLP_DIM)), _layer_spec((1, MLP_DIM)),       # w1, b1
        _layer_spec((MLP_DIM, WIDTH)), _layer_spec((1, WIDTH)),         # w2, b2
        _const_spec((1, WIDTH)), _const_spec((1, WIDTH)),               # ln_post g/b
        _const_spec((WIDTH, EMBED)),                                    # proj
        _const_spec((EMBED, OUT_PAD)),                                  # aes_fc (padded)
    ]

    out = pl.pallas_call(
        _fused_clip_kernel,
        out_shape=jax.ShapeDtypeStruct((nb, B_BLK, OUT_PAD), jnp.float32),
        grid=(nb, LAYERS),                          # batch blocks x layers
        in_specs=in_specs,
        out_specs=pl.BlockSpec((1, B_BLK, OUT_PAD), lambda b, l: (b, 0, 0)),
        scratch_shapes=[
            pltpu.VMEM((M_ROWS, WIDTH), jnp.float32),   # residual stream h
            pltpu.VMEM((M_ROWS, WIDTH), jnp.float32),   # per-head context assembly
        ],
        compiler_params=pltpu.CompilerParams(
            dimension_semantics=("parallel", "arbitrary"),  # v7x: shard batch over 2 TCs
            vmem_limit_bytes=48 * 1024 * 1024),
    )(*inputs)
    return out.reshape(B, OUT_PAD)[:, :OUT_LEN]


# ------------------------------ parameter init ------------------------------
def init_params(key):
    ks = iter(jax.random.split(key, 64))
    wscale = WIDTH ** -0.5

    def nrm(shape, s=0.05):
        return (s * jax.random.normal(next(ks), shape)).astype(jnp.float32)

    params = {
        "conv_w": nrm((PATCH_DIM, WIDTH)),             # conv1 weight, flattened & transposed
        "class_emb": nrm((WIDTH,), wscale),
        "pos_emb": nrm((TOKENS, WIDTH), wscale),
        "ln_pre_g": jnp.ones((WIDTH,), jnp.float32),
        "ln_pre_b": jnp.zeros((WIDTH,), jnp.float32),
        "ln_post_g": jnp.ones((WIDTH,), jnp.float32),
        "ln_post_b": jnp.zeros((WIDTH,), jnp.float32),
        "proj": nrm((WIDTH, EMBED), wscale),
        "aes_fc_w": nrm((EMBED, OUT_LEN)),             # aes_fc: Linear(EMBED, OUT_LEN, bias=False)
        "blocks": [],
    }
    for _ in range(LAYERS):
        params["blocks"].append({
            "ln1_g": jnp.ones((WIDTH,), jnp.float32),
            "ln1_b": jnp.zeros((WIDTH,), jnp.float32),
            "attn_in_w": nrm((WIDTH, 3 * WIDTH)),      # == in_proj_weight.T
            "attn_in_b": nrm((3 * WIDTH,), 0.01),
            "attn_out_w": nrm((WIDTH, WIDTH)),
            "attn_out_b": nrm((WIDTH,), 0.01),
            "ln2_g": jnp.ones((WIDTH,), jnp.float32),
            "ln2_b": jnp.zeros((WIDTH,), jnp.float32),
            "mlp_w1": nrm((WIDTH, 4 * WIDTH)),
            "mlp_b1": nrm((4 * WIDTH,), 0.01),
            "mlp_w2": nrm((4 * WIDTH, WIDTH)),
            "mlp_b2": nrm((WIDTH,), 0.01),
        })
    return params


# ------------------------------ main ------------------------------
if __name__ == "__main__":
    key = jax.random.PRNGKey(0)
    k_x, k_p = jax.random.split(key)
    x = jax.random.normal(k_x, (BATCH, CHANS, IMG, IMG), dtype=jnp.float32)
    params = init_params(k_p)

    out = jax.jit(clip4aes_forward)(x, params)
    out = jax.block_until_ready(out)

    assert out.shape == (BATCH, OUT_LEN), out.shape
    assert out.dtype == jnp.float32
    assert bool(jnp.all(jnp.isfinite(out)))
    print("KERNEL_OK")
</pallas_src>

<mosaic_0001>
module attributes {stable_mosaic.version = 11 : i64} {
  func.func @_fused_clip_kernel(%arg0: i32, %arg1: i32, %arg2: memref<1x10x192xf32, #tpu.memory_space<vmem>>, %arg3: memref<10x10xf32, #tpu.memory_space<vmem>>, %arg4: memref<192x32xbf16, #tpu.memory_space<vmem>>, %arg5: memref<10x32xf32, #tpu.memory_space<vmem>>, %arg6: memref<1x32xf32, #tpu.memory_space<vmem>>, %arg7: memref<1x32xf32, #tpu.memory_space<vmem>>, %arg8: memref<1x1x32xf32, #tpu.memory_space<vmem>>, %arg9: memref<1x1x32xf32, #tpu.memory_space<vmem>>, %arg10: memref<1x32x32xbf16, #tpu.memory_space<vmem>>, %arg11: memref<1x1x32xf32, #tpu.memory_space<vmem>>, %arg12: memref<1x32x32xbf16, #tpu.memory_space<vmem>>, %arg13: memref<1x1x32xf32, #tpu.memory_space<vmem>>, %arg14: memref<1x32x32xbf16, #tpu.memory_space<vmem>>, %arg15: memref<1x1x32xf32, #tpu.memory_space<vmem>>, %arg16: memref<1x32x32xbf16, #tpu.memory_space<vmem>>, %arg17: memref<1x1x32xf32, #tpu.memory_space<vmem>>, %arg18: memref<1x1x32xf32, #tpu.memory_space<vmem>>, %arg19: memref<1x1x32xf32, #tpu.memory_space<vmem>>, %arg20: memref<1x32x128xbf16, #tpu.memory_space<vmem>>, %arg21: memref<1x1x128xf32, #tpu.memory_space<vmem>>, %arg22: memref<1x128x32xbf16, #tpu.memory_space<vmem>>, %arg23: memref<1x1x32xf32, #tpu.memory_space<vmem>>, %arg24: memref<1x32xf32, #tpu.memory_space<vmem>>, %arg25: memref<1x32xf32, #tpu.memory_space<vmem>>, %arg26: memref<32x32xbf16, #tpu.memory_space<vmem>>, %arg27: memref<32x128xbf16, #tpu.memory_space<vmem>>, %arg28: memref<1x2x128xf32, #tpu.memory_space<vmem>>, %arg29: memref<10x32xf32, #tpu.memory_space<vmem>>, %arg30: memref<10x32xf32, #tpu.memory_space<vmem>>) attributes {dimension_semantics = [#tpu.dimension_semantics<parallel>, #tpu.dimension_semantics<arbitrary>], iteration_bounds = array<i64: 2, 2>, scalar_prefetch = 0 : i64, scratch_operands = 2 : i64, tpu.core_type = #tpu.core_type<tc>, window_params = [{transform_indices = @transform_0, window_bounds = array<i64: 1, 10, 192>}, {pipeline_mode = #tpu.pipeline_mode<synchronous>, transform_indices = @transform_1, window_bounds = array<i64: 10, 10>}, {pipeline_mode = #tpu.pipeline_mode<synchronous>, transform_indices = @transform_2, window_bounds = array<i64: 192, 32>}, {pipeline_mode = #tpu.pipeline_mode<synchronous>, transform_indices = @transform_3, window_bounds = array<i64: 10, 32>}, {pipeline_mode = #tpu.pipeline_mode<synchronous>, transform_indices = @transform_4, window_bounds = array<i64: 1, 32>}, {pipeline_mode = #tpu.pipeline_mode<synchronous>, transform_indices = @transform_5, window_bounds = array<i64: 1, 32>}, {transform_indices = @transform_6, window_bounds = array<i64: 1, 1, 32>}, {transform_indices = @transform_7, window_bounds = array<i64: 1, 1, 32>}, {transform_indices = @transform_8, window_bounds = array<i64: 1, 32, 32>}, {transform_indices = @transform_9, window_bounds = array<i64: 1, 1, 32>}, {transform_indices = @transform_10, window_bounds = array<i64: 1, 32, 32>}, {transform_indices = @transform_11, window_bounds = array<i64: 1, 1, 32>}, {transform_indices = @transform_12, window_bounds = array<i64: 1, 32, 32>}, {transform_indices = @transform_13, window_bounds = array<i64: 1, 1, 32>}, {transform_indices = @transform_14, window_bounds = array<i64: 1, 32, 32>}, {transform_indices = @transform_15, window_bounds = array<i64: 1, 1, 32>}, {transform_indices = @transform_16, window_bounds = array<i64: 1, 1, 32>}, {transform_indices = @transform_17, window_bounds = array<i64: 1, 1, 32>}, {transform_indices = @transform_18, window_bounds = array<i64: 1, 32, 128>}, {transform_indices = @transform_19, window_bounds = array<i64: 1, 1, 128>}, {transform_indices = @transform_20, window_bounds = array<i64: 1, 128, 32>}, {transform_indices = @transform_21, window_bounds = array<i64: 1, 1, 32>}, {pipeline_mode = #tpu.pipeline_mode<synchronous>, transform_indices = @transform_22, window_bounds = array<i64: 1, 32>}, {pipeline_mode = #tpu.pipeline_mode<synchronous>, transform_indices = @transform_23, window_bounds = array<i64: 1, 32>}, {pipeline_mode = #tpu.pipeline_mode<synchronous>, transform_indices = @transform_24, window_bounds = array<i64: 32, 32>}, {pipeline_mode = #tpu.pipeline_mode<synchronous>, transform_indices = @transform_25, window_bounds = array<i64: 32, 128>}, {transform_indices = @transform_26, window_bounds = array<i64: 1, 2, 128>}]} {
    %c0_i32 = arith.constant 0 : i32
    %0 = arith.cmpi eq, %arg1, %c0_i32 : i32
    %1 = arith.extui %0 : i1 to i32
    %c0_i32_0 = arith.constant 0 : i32
    %2 = arith.cmpi ne, %1, %c0_i32_0 : i32
    scf.if %2 {
      %c0_95 = arith.constant 0 : index
      %c0_96 = arith.constant 0 : index
      %c0_97 = arith.constant 0 : index
      %202 = vector.load %arg2[%c0_95, %c0_96, %c0_97] : memref<1x10x192xf32, #tpu.memory_space<vmem>>, vector<1x10x192xf32>
      %203 = vector.shape_cast %202 : vector<1x10x192xf32> to vector<10x192xf32>
      %204 = arith.truncf %203 : vector<10x192xf32> to vector<10x192xbf16>
      %c0_98 = arith.constant 0 : index
      %c0_99 = arith.constant 0 : index
      %205 = vector.load %arg4[%c0_98, %c0_99] : memref<192x32xbf16, #tpu.memory_space<vmem>>, vector<192x32xbf16>
      %cst_100 = arith.constant dense<0.000000e+00> : vector<10x32xf32>
      %206 = tpu.matmul %204, %205, %cst_100 {dimension_numbers = #tpu.dot_dimension_numbers<[1], [0], [0], [1], [0, 0, 1, 1], [], []>} : vector<10x192xbf16>, vector<192x32xbf16>, vector<10x32xf32> -> vector<10x32xf32>
      %c0_101 = arith.constant 0 : index
      %c0_102 = arith.constant 0 : index
      %207 = vector.load %arg5[%c0_101, %c0_102] : memref<10x32xf32, #tpu.memory_space<vmem>>, vector<10x32xf32>
      %208 = arith.addf %206, %207 : vector<10x32xf32>
      %c0_103 = arith.constant 0 : index
      %c0_104 = arith.constant 0 : index
      %209 = vector.load %arg6[%c0_103, %c0_104] : memref<1x32xf32, #tpu.memory_space<vmem>>, vector<1x32xf32>
      %c0_105 = arith.constant 0 : index
      %c0_106 = arith.constant 0 : index
      %210 = vector.load %arg7[%c0_105, %c0_106] : memref<1x32xf32, #tpu.memory_space<vmem>>, vector<1x32xf32>
      %cst_107 = arith.constant dense<0.000000e+00> : vector<10xf32>
      %211 = vector.multi_reduction <add>, %208, %cst_107 [1] : vector<10x32xf32> to vector<10xf32>
      %212 = vector.shape_cast %211 : vector<10xf32> to vector<10x1xf32>
      %cst_108 = arith.constant 3.200000e+01 : f32
      %213 = vector.broadcast %cst_108 : f32 to vector<10x1xf32>
      %214 = arith.divf %212, %213 : vector<10x1xf32>
      %215 = vector.broadcast %214 : vector<10x1xf32> to vector<10x32xf32>
      %216 = arith.subf %208, %215 : vector<10x32xf32>
      %217 = arith.mulf %216, %216 : vector<10x32xf32>
      %cst_109 = arith.constant dense<0.000000e+00> : vector<10xf32>
      %218 = vector.multi_reduction <add>, %217, %cst_109 [1] : vector<10x32xf32> to vector<10xf32>
      %219 = vector.shape_cast %218 : vector<10xf32> to vector<10x1xf32>
      %cst_110 = arith.constant 3.200000e+01 : f32
      %220 = vector.broadcast %cst_110 : f32 to vector<10x1xf32>
      %221 = arith.divf %219, %220 : vector<10x1xf32>
      %222 = vector.broadcast %214 : vector<10x1xf32> to vector<10x32xf32>
      %223 = arith.subf %208, %222 : vector<10x32xf32>
      %cst_111 = arith.constant 9.99999974E-6 : f32
      %224 = vector.broadcast %cst_111 : f32 to vector<10x1xf32>
      %225 = arith.addf %221, %224 : vector<10x1xf32>
      %226 = math.rsqrt %225 : vector<10x1xf32>
      %227 = vector.broadcast %226 : vector<10x1xf32> to vector<10x32xf32>
      %228 = arith.mulf %223, %227 : vector<10x32xf32>
      %229 = vector.broadcast %209 : vector<1x32xf32> to vector<10x32xf32>
      %230 = arith.mulf %228, %229 : vector<10x32xf32>
      %231 = vector.broadcast %210 : vector<1x32xf32> to vector<10x32xf32>
      %232 = arith.addf %230, %231 : vector<10x32xf32>
      %c0_112 = arith.constant 0 : index
      %c0_113 = arith.constant 0 : index
      %233 = vector.load %arg29[%c0_112, %c0_113] : memref<10x32xf32, #tpu.memory_space<vmem>>, vector<10x32xf32>
      tpu.vector_store %arg29[%c0_112, %c0_113], %232 {strides = array<i32>} : memref<10x32xf32, #tpu.memory_space<vmem>>, vector<10x32xf32>,
    } else {
    }
    %c0 = arith.constant 0 : index
    %c0_1 = arith.constant 0 : index
    %3 = vector.load %arg29[%c0, %c0_1] : memref<10x32xf32, #tpu.memory_space<vmem>>, vector<10x32xf32>
    %c0_2 = arith.constant 0 : index
    %c0_3 = arith.constant 0 : index
    %c0_4 = arith.constant 0 : index
    %4 = vector.load %arg8[%c0_2, %c0_3, %c0_4] : memref<1x1x32xf32, #tpu.memory_space<vmem>>, vector<1x1x32xf32>
    %5 = vector.shape_cast %4 : vector<1x1x32xf32> to vector<1x32xf32>
    %c0_5 = arith.constant 0 : index
    %c0_6 = arith.constant 0 : index
    %c0_7 = arith.constant 0 : index
    %6 = vector.load %arg9[%c0_5, %c0_6, %c0_7] : memref<1x1x32xf32, #tpu.memory_space<vmem>>, vector<1x1x32xf32>
    %7 = vector.shape_cast %6 : vector<1x1x32xf32> to vector<1x32xf32>
    %cst = arith.constant dense<0.000000e+00> : vector<10xf32>
    %8 = vector.multi_reduction <add>, %3, %cst [1] : vector<10x32xf32> to vector<10xf32>
    %9 = vector.shape_cast %8 : vector<10xf32> to vector<10x1xf32>
    %cst_8 = arith.constant 3.200000e+01 : f32
    %10 = vector.broadcast %cst_8 : f32 to vector<10x1xf32>
    %11 = arith.divf %9, %10 : vector<10x1xf32>
    %12 = vector.broadcast %11 : vector<10x1xf32> to vector<10x32xf32>
    %13 = arith.subf %3, %12 : vector<10x32xf32>
    %14 = arith.mulf %13, %13 : vector<10x32xf32>
    %cst_9 = arith.constant dense<0.000000e+00> : vector<10xf32>
    %15 = vector.multi_reduction <add>, %14, %cst_9 [1] : vector<10x32xf32> to vector<10xf32>
    %16 = vector.shape_cast %15 : vector<10xf32> to vector<10x1xf32>
    %cst_10 = arith.constant 3.200000e+01 : f32
    %17 = vector.broadcast %cst_10 : f32 to vector<10x1xf32>
    %18 = arith.divf %16, %17 : vector<10x1xf32>
    %19 = vector.broadcast %11 : vector<10x1xf32> to vector<10x32xf32>
    %20 = arith.subf %3, %19 : vector<10x32xf32>
    %cst_11 = arith.constant 9.99999974E-6 : f32
    %21 = vector.broadcast %cst_11 : f32 to vector<10x1xf32>
    %22 = arith.addf %18, %21 : vector<10x1xf32>
    %23 = math.rsqrt %22 : vector<10x1xf32>
    %24 = vector.broadcast %23 : vector<10x1xf32> to vector<10x32xf32>
    %25 = arith.mulf %20, %24 : vector<10x32xf32>
    %26 = vector.broadcast %5 : vector<1x32xf32> to vector<10x32xf32>
    %27 = arith.mulf %25, %26 : vector<10x32xf32>
    %28 = vector.broadcast %7 : vector<1x32xf32> to vector<10x32xf32>
    %29 = arith.addf %27, %28 : vector<10x32xf32>
    %30 = arith.truncf %29 : vector<10x32xf32> to vector<10x32xbf16>
    %c0_12 = arith.constant 0 : index
    %c0_13 = arith.constant 0 : index
    %c0_14 = arith.constant 0 : index
    %31 = vector.load %arg10[%c0_12, %c0_13, %c0_14] : memref<1x32x32xbf16, #tpu.memory_space<vmem>>, vector<1x32x32xbf16>
    %32 = vector.shape_cast %31 : vector<1x32x32xbf16> to vector<32x32xbf16>
    %cst_15 = arith.constant dense<0.000000e+00> : vector<10x32xf32>
    %33 = tpu.matmul %30, %32, %cst_15 {dimension_numbers = #tpu.dot_dimension_numbers<[1], [0], [0], [1], [0, 0, 1, 1], [], []>} : vector<10x32xbf16>, vector<32x32xbf16>, vector<10x32xf32> -> vector<10x32xf32>
    %c0_16 = arith.constant 0 : index
    %c0_17 = arith.constant 0 : index
    %c0_18 = arith.constant 0 : index
    %34 = vector.load %arg11[%c0_16, %c0_17, %c0_18] : memref<1x1x32xf32, #tpu.memory_space<vmem>>, vector<1x1x32xf32>
    %35 = vector.shape_cast %34 : vector<1x1x32xf32> to vector<1x32xf32>
    %36 = vector.broadcast %35 : vector<1x32xf32> to vector<10x32xf32>
    %37 = arith.addf %33, %36 : vector<10x32xf32>
    %c0_19 = arith.constant 0 : index
    %c0_20 = arith.constant 0 : index
    %c0_21 = arith.constant 0 : index
    %38 = vector.load %arg12[%c0_19, %c0_20, %c0_21] : memref<1x32x32xbf16, #tpu.memory_space<vmem>>, vector<1x32x32xbf16>
    %39 = vector.shape_cast %38 : vector<1x32x32xbf16> to vector<32x32xbf16>
    %cst_22 = arith.constant dense<0.000000e+00> : vector<10x32xf32>
    %40 = tpu.matmul %30, %39, %cst_22 {dimension_numbers = #tpu.dot_dimension_numbers<[1], [0], [0], [1], [0, 0, 1, 1], [], []>} : vector<10x32xbf16>, vector<32x32xbf16>, vector<10x32xf32> -> vector<10x32xf32>
    %c0_23 = arith.constant 0 : index
    %c0_24 = arith.constant 0 : index
    %c0_25 = arith.constant 0 : index
    %41 = vector.load %arg13[%c0_23, %c0_24, %c0_25] : memref<1x1x32xf32, #tpu.memory_space<vmem>>, vector<1x1x32xf32>
    %42 = vector.shape_cast %41 : vector<1x1x32xf32> to vector<1x32xf32>
    %43 = vector.broadcast %42 : vector<1x32xf32> to vector<10x32xf32>
    %44 = arith.addf %40, %43 : vector<10x32xf32>
    %c0_26 = arith.constant 0 : index
    %c0_27 = arith.constant 0 : index
    %c0_28 = arith.constant 0 : index
    %45 = vector.load %arg14[%c0_26, %c0_27, %c0_28] : memref<1x32x32xbf16, #tpu.memory_space<vmem>>, vector<1x32x32xbf16>
    %46 = vector.shape_cast %45 : vector<1x32x32xbf16> to vector<32x32xbf16>
    %cst_29 = arith.constant dense<0.000000e+00> : vector<10x32xf32>
    %47 = tpu.matmul %30, %46, %cst_29 {dimension_numbers = #tpu.dot_dimension_numbers<[1], [0], [0], [1], [0, 0, 1, 1], [], []>} : vector<10x32xbf16>, vector<32x32xbf16>, vector<10x32xf32> -> vector<10x32xf32>
    %c0_30 = arith.constant 0 : index
    %c0_31 = arith.constant 0 : index
    %c0_32 = arith.constant 0 : index
    %48 = vector.load %arg15[%c0_30, %c0_31, %c0_32] : memref<1x1x32xf32, #tpu.memory_space<vmem>>, vector<1x1x32xf32>
    %49 = vector.shape_cast %48 : vector<1x1x32xf32> to vector<1x32xf32>
    %50 = vector.broadcast %49 : vector<1x32xf32> to vector<10x32xf32>
    %51 = arith.addf %47, %50 : vector<10x32xf32>
    %c0_33 = arith.constant 0 : index
    %c0_34 = arith.constant 0 : index
    %52 = vector.load %arg3[%c0_33, %c0_34] : memref<10x10xf32, #tpu.memory_space<vmem>>, vector<10x10xf32>
    %53 = vector.extract_strided_slice %37 {offsets = [0, 0], sizes = [10, 8], strides = [1, 1]} : vector<10x32xf32> to vector<10x8xf32>
    %54 = arith.truncf %53 : vector<10x8xf32> to vector<10x8xbf16>
    %55 = vector.extract_strided_slice %44 {offsets = [0, 0], sizes = [10, 8], strides = [1, 1]} : vector<10x32xf32> to vector<10x8xf32>
    %56 = arith.truncf %55 : vector<10x8xf32> to vector<10x8xbf16>
    %57 = vector.extract_strided_slice %51 {offsets = [0, 0], sizes = [10, 8], strides = [1, 1]} : vector<10x32xf32> to vector<10x8xf32>
    %58 = arith.truncf %57 : vector<10x8xf32> to vector<10x8xbf16>
    %cst_35 = arith.constant dense<0.000000e+00> : vector<10x10xf32>
    %59 = tpu.matmul %54, %56, %cst_35 {dimension_numbers = #tpu.dot_dimension_numbers<[1], [1], [0], [0], [0, 0, 1, 0], [], []>} : vector<10x8xbf16>, vector<10x8xbf16>, vector<10x10xf32> -> vector<10x10xf32>
    %60 = arith.addf %59, %52 : vector<10x10xf32>
    %cst_36 = arith.constant dense<0xFF800000> : vector<10xf32>
    %61 = vector.multi_reduction <maximumf>, %60, %cst_36 [1] : vector<10x10xf32> to vector<10xf32>
    %62 = vector.shape_cast %61 : vector<10xf32> to vector<10x1xf32>
    %63 = vector.broadcast %62 : vector<10x1xf32> to vector<10x10xf32>
    %64 = arith.subf %60, %63 : vector<10x10xf32>
    %65 = math.exp %64 : vector<10x10xf32>
    %cst_37 = arith.constant dense<0.000000e+00> : vector<10xf32>
    %66 = vector.multi_reduction <add>, %65, %cst_37 [1] : vector<10x10xf32> to vector<10xf32>
    %67 = vector.shape_cast %66 : vector<10xf32> to vector<10x1xf32>
    %68 = tpu.reciprocal %67 {approx = true} : vector<10x1xf32> -> vector<10x1xf32>
    %69 = vector.broadcast %68 : vector<10x1xf32> to vector<10x10xf32>
    %70 = arith.mulf %65, %69 : vector<10x10xf32>
    %71 = arith.truncf %70 : vector<10x10xf32> to vector<10x10xbf16>
    %cst_38 = arith.constant dense<0.000000e+00> : vector<10x8xf32>
    %72 = tpu.matmul %71, %58, %cst_38 {dimension_numbers = #tpu.dot_dimension_numbers<[1], [0], [0], [1], [0, 0, 1, 1], [], []>} : vector<10x10xbf16>, vector<10x8xbf16>, vector<10x8xf32> -> vector<10x8xf32>
    %c0_39 = arith.constant 0 : index
    %c0_40 = arith.constant 0 : index
    %73 = vector.load %arg30[%c0_39, %c0_40] : memref<10x32xf32, #tpu.memory_space<vmem>>, vector<10x8xf32>
    tpu.vector_store %arg30[%c0_39, %c0_40], %72 {strides = array<i32>} : memref<10x32xf32, #tpu.memory_space<vmem>>, vector<10x8xf32>,
    %74 = vector.extract_strided_slice %37 {offsets = [0, 8], sizes = [10, 8], strides = [1, 1]} : vector<10x32xf32> to vector<10x8xf32>
    %75 = arith.truncf %74 : vector<10x8xf32> to vector<10x8xbf16>
    %76 = vector.extract_strided_slice %44 {offsets = [0, 8], sizes = [10, 8], strides = [1, 1]} : vector<10x32xf32> to vector<10x8xf32>
    %77 = arith.truncf %76 : vector<10x8xf32> to vector<10x8xbf16>
    %78 = vector.extract_strided_slice %51 {offsets = [0, 8], sizes = [10, 8], strides = [1, 1]} : vector<10x32xf32> to vector<10x8xf32>
    %79 = arith.truncf %78 : vector<10x8xf32> to vector<10x8xbf16>
    %cst_41 = arith.constant dense<0.000000e+00> : vector<10x10xf32>
    %80 = tpu.matmul %75, %77, %cst_41 {dimension_numbers = #tpu.dot_dimension_numbers<[1], [1], [0], [0], [0, 0, 1, 0], [], []>} : vector<10x8xbf16>, vector<10x8xbf16>, vector<10x10xf32> -> vector<10x10xf32>
    %81 = arith.addf %80, %52 : vector<10x10xf32>
    %cst_42 = arith.constant dense<0xFF800000> : vector<10xf32>
    %82 = vector.multi_reduction <maximumf>, %81, %cst_42 [1] : vector<10x10xf32> to vector<10xf32>
    %83 = vector.shape_cast %82 : vector<10xf32> to vector<10x1xf32>
    %84 = vector.broadcast %83 : vector<10x1xf32> to vector<10x10xf32>
    %85 = arith.subf %81, %84 : vector<10x10xf32>
    %86 = math.exp %85 : vector<10x10xf32>
    %cst_43 = arith.constant dense<0.000000e+00> : vector<10xf32>
    %87 = vector.multi_reduction <add>, %86, %cst_43 [1] : vector<10x10xf32> to vector<10xf32>
    %88 = vector.shape_cast %87 : vector<10xf32> to vector<10x1xf32>
    %89 = tpu.reciprocal %88 {approx = true} : vector<10x1xf32> -> vector<10x1xf32>
    %90 = vector.broadcast %89 : vector<10x1xf32> to vector<10x10xf32>
    %91 = arith.mulf %86, %90 : vector<10x10xf32>
    %92 = arith.truncf %91 : vector<10x10xf32> to vector<10x10xbf16>
    %cst_44 = arith.constant dense<0.000000e+00> : vector<10x8xf32>
    %93 = tpu.matmul %92, %79, %cst_44 {dimension_numbers = #tpu.dot_dimension_numbers<[1], [0], [0], [1], [0, 0, 1, 1], [], []>} : vector<10x10xbf16>, vector<10x8xbf16>, vector<10x8xf32> -> vector<10x8xf32>
    %c0_45 = arith.constant 0 : index
    %c8 = arith.constant 8 : index
    %94 = vector.load %arg30[%c0_45, %c8] : memref<10x32xf32, #tpu.memory_space<vmem>>, vector<10x8xf32>
    tpu.vector_store %arg30[%c0_45, %c8], %93 {strides = array<i32>} : memref<10x32xf32, #tpu.memory_space<vmem>>, vector<10x8xf32>,
    %95 = vector.extract_strided_slice %37 {offsets = [0, 16], sizes = [10, 8], strides = [1, 1]} : vector<10x32xf32> to vector<10x8xf32>
    %96 = arith.truncf %95 : vector<10x8xf32> to vector<10x8xbf16>
    %97 = vector.extract_strided_slice %44 {offsets = [0, 16], sizes = [10, 8], strides = [1, 1]} : vector<10x32xf32> to vector<10x8xf32>
    %98 = arith.truncf %97 : vector<10x8xf32> to vector<10x8xbf16>
    %99 = vector.extract_strided_slice %51 {offsets = [0, 16], sizes = [10, 8], strides = [1, 1]} : vector<10x32xf32> to vector<10x8xf32>
    %100 = arith.truncf %99 : vector<10x8xf32> to vector<10x8xbf16>
    %cst_46 = arith.constant dense<0.000000e+00> : vector<10x10xf32>
    %101 = tpu.matmul %96, %98, %cst_46 {dimension_numbers = #tpu.dot_dimension_numbers<[1], [1], [0], [0], [0, 0, 1, 0], [], []>} : vector<10x8xbf16>, vector<10x8xbf16>, vector<10x10xf32> -> vector<10x10xf32>
    %102 = arith.addf %101, %52 : vector<10x10xf32>
    %cst_47 = arith.constant dense<0xFF800000> : vector<10xf32>
    %103 = vector.multi_reduction <maximumf>, %102, %cst_47 [1] : vector<10x10xf32> to vector<10xf32>
    %104 = vector.shape_cast %103 : vector<10xf32> to vector<10x1xf32>
    %105 = vector.broadcast %104 : vector<10x1xf32> to vector<10x10xf32>
    %106 = arith.subf %102, %105 : vector<10x10xf32>
    %107 = math.exp %106 : vector<10x10xf32>
    %cst_48 = arith.constant dense<0.000000e+00> : vector<10xf32>
    %108 = vector.multi_reduction <add>, %107, %cst_48 [1] : vector<10x10xf32> to vector<10xf32>
    %109 = vector.shape_cast %108 : vector<10xf32> to vector<10x1xf32>
    %110 = tpu.reciprocal %109 {approx = true} : vector<10x1xf32> -> vector<10x1xf32>
    %111 = vector.broadcast %110 : vector<10x1xf32> to vector<10x10xf32>
    %112 = arith.mulf %107, %111 : vector<10x10xf32>
    %113 = arith.truncf %112 : vector<10x10xf32> to vector<10x10xbf16>
    %cst_49 = arith.constant dense<0.000000e+00> : vector<10x8xf32>
    %114 = tpu.matmul %113, %100, %cst_49 {dimension_numbers = #tpu.dot_dimension_numbers<[1], [0], [0], [1], [0, 0, 1, 1], [], []>} : vector<10x10xbf16>, vector<10x8xbf16>, vector<10x8xf32> -> vector<10x8xf32>
    %c0_50 = arith.constant 0 : index
    %c16 = arith.constant 16 : index
    %115 = vector.load %arg30[%c0_50, %c16] : memref<10x32xf32, #tpu.memory_space<vmem>>, vector<10x8xf32>
    tpu.vector_store %arg30[%c0_50, %c16], %114 {strides = array<i32>} : memref<10x32xf32, #tpu.memory_space<vmem>>, vector<10x8xf32>,
    %116 = vector.extract_strided_slice %37 {offsets = [0, 24], sizes = [10, 8], strides = [1, 1]} : vector<10x32xf32> to vector<10x8xf32>
    %117 = arith.truncf %116 : vector<10x8xf32> to vector<10x8xbf16>
    %118 = vector.extract_strided_slice %44 {offsets = [0, 24], sizes = [10, 8], strides = [1, 1]} : vector<10x32xf32> to vector<10x8xf32>
    %119 = arith.truncf %118 : vector<10x8xf32> to vector<10x8xbf16>
    %120 = vector.extract_strided_slice %51 {offsets = [0, 24], sizes = [10, 8], strides = [1, 1]} : vector<10x32xf32> to vector<10x8xf32>
    %121 = arith.truncf %120 : vector<10x8xf32> to vector<10x8xbf16>
    %cst_51 = arith.constant dense<0.000000e+00> : vector<10x10xf32>
    %122 = tpu.matmul %117, %119, %cst_51 {dimension_numbers = #tpu.dot_dimension_numbers<[1], [1], [0], [0], [0, 0, 1, 0], [], []>} : vector<10x8xbf16>, vector<10x8xbf16>, vector<10x10xf32> -> vector<10x10xf32>
    %123 = arith.addf %122, %52 : vector<10x10xf32>
    %cst_52 = arith.constant dense<0xFF800000> : vector<10xf32>
    %124 = vector.multi_reduction <maximumf>, %123, %cst_52 [1] : vector<10x10xf32> to vector<10xf32>
    %125 = vector.shape_cast %124 : vector<10xf32> to vector<10x1xf32>
    %126 = vector.broadcast %125 : vector<10x1xf32> to vector<10x10xf32>
    %127 = arith.subf %123, %126 : vector<10x10xf32>
    %128 = math.exp %127 : vector<10x10xf32>
    %cst_53 = arith.constant dense<0.000000e+00> : vector<10xf32>
    %129 = vector.multi_reduction <add>, %128, %cst_53 [1] : vector<10x10xf32> to vector<10xf32>
    %130 = vector.shape_cast %129 : vector<10xf32> to vector<10x1xf32>
    %131 = tpu.reciprocal %130 {approx = true} : vector<10x1xf32> -> vector<10x1xf32>
    %132 = vector.broadcast %131 : vector<10x1xf32> to vector<10x10xf32>
    %133 = arith.mulf %128, %132 : vector<10x10xf32>
    %134 = arith.truncf %133 : vector<10x10xf32> to vector<10x10xbf16>
    %cst_54 = arith.constant dense<0.000000e+00> : vector<10x8xf32>
    %135 = tpu.matmul %134, %121, %cst_54 {dimension_numbers = #tpu.dot_dimension_numbers<[1], [0], [0], [1], [0, 0, 1, 1], [], []>} : vector<10x10xbf16>, vector<10x8xbf16>, vector<10x8xf32> -> vector<10x8xf32>
    %c0_55 = arith.constant 0 : index
    %c24 = arith.constant 24 : index
    %136 = vector.load %arg30[%c0_55, %c24] : memref<10x32xf32, #tpu.memory_space<vmem>>, vector<10x8xf32>
    tpu.vector_store %arg30[%c0_55, %c24], %135 {strides = array<i32>} : memref<10x32xf32, #tpu.memory_space<vmem>>, vector<10x8xf32>,
    %c0_56 = arith.constant 0 : index
    %c0_57 = arith.constant 0 : index
    %137 = vector.load %arg30[%c0_56, %c0_57] : memref<10x32xf32, #tpu.memory_space<vmem>>, vector<10x32xf32>
    %138 = arith.truncf %137 : vector<10x32xf32> to vector<10x32xbf16>
    %c0_58 = arith.constant 0 : index
    %c0_59 = arith.constant 0 : index
    %c0_60 = arith.constant 0 : index
    %139 = vector.load %arg16[%c0_58, %c0_59, %c0_60] : memref<1x32x32xbf16, #tpu.memory_space<vmem>>, vector<1x32x32xbf16>
    %140 = vector.shape_cast %139 : vector<1x32x32xbf16> to vector<32x32xbf16>
    %cst_61 = arith.constant dense<0.000000e+00> : vector<10x32xf32>
    %141 = tpu.matmul %138, %140, %cst_61 {dimension_numbers = #tpu.dot_dimension_numbers<[1], [0], [0], [1], [0, 0, 1, 1], [], []>} : vector<10x32xbf16>, vector<32x32xbf16>, vector<10x32xf32> -> vector<10x32xf32>
    %c0_62 = arith.constant 0 : index
    %c0_63 = arith.constant 0 : index
    %c0_64 = arith.constant 0 : index
    %142 = vector.load %arg17[%c0_62, %c0_63, %c0_64] : memref<1x1x32xf32, #tpu.memory_space<vmem>>, vector<1x1x32xf32>
    %143 = vector.shape_cast %142 : vector<1x1x32xf32> to vector<1x32xf32>
    %144 = vector.broadcast %143 : vector<1x32xf32> to vector<10x32xf32>
    %145 = arith.addf %141, %144 : vector<10x32xf32>
    %146 = arith.addf %3, %145 : vector<10x32xf32>
    %c0_65 = arith.constant 0 : index
    %c0_66 = arith.constant 0 : index
    %c0_67 = arith.constant 0 : index
    %147 = vector.load %arg18[%c0_65, %c0_66, %c0_67] : memref<1x1x32xf32, #tpu.memory_space<vmem>>, vector<1x1x32xf32>
    %148 = vector.shape_cast %147 : vector<1x1x32xf32> to vector<1x32xf32>
    %c0_68 = arith.constant 0 : index
    %c0_69 = arith.constant 0 : index
    %c0_70 = arith.constant 0 : index
    %149 = vector.load %arg19[%c0_68, %c0_69, %c0_70] : memref<1x1x32xf32, #tpu.memory_space<vmem>>, vector<1x1x32xf32>
    %150 = vector.shape_cast %149 : vector<1x1x32xf32> to vector<1x32xf32>
    %cst_71 = arith.constant dense<0.000000e+00> : vector<10xf32>
    %151 = vector.multi_reduction <add>, %146, %cst_71 [1] : vector<10x32xf32> to vector<10xf32>
    %152 = vector.shape_cast %151 : vector<10xf32> to vector<10x1xf32>
    %cst_72 = arith.constant 3.200000e+01 : f32
    %153 = vector.broadcast %cst_72 : f32 to vector<10x1xf32>
    %154 = arith.divf %152, %153 : vector<10x1xf32>
    %155 = vector.broadcast %154 : vector<10x1xf32> to vector<10x32xf32>
    %156 = arith.subf %146, %155 : vector<10x32xf32>
    %157 = arith.mulf %156, %156 : vector<10x32xf32>
    %cst_73 = arith.constant dense<0.000000e+00> : vector<10xf32>
    %158 = vector.multi_reduction <add>, %157, %cst_73 [1] : vector<10x32xf32> to vector<10xf32>
    %159 = vector.shape_cast %158 : vector<10xf32> to vector<10x1xf32>
    %cst_74 = arith.constant 3.200000e+01 : f32
    %160 = vector.broadcast %cst_74 : f32 to vector<10x1xf32>
    %161 = arith.divf %159, %160 : vector<10x1xf32>
    %162 = vector.broadcast %154 : vector<10x1xf32> to vector<10x32xf32>
    %163 = arith.subf %146, %162 : vector<10x32xf32>
    %cst_75 = arith.constant 9.99999974E-6 : f32
    %164 = vector.broadcast %cst_75 : f32 to vector<10x1xf32>
    %165 = arith.addf %161, %164 : vector<10x1xf32>
    %166 = math.rsqrt %165 : vector<10x1xf32>
    %167 = vector.broadcast %166 : vector<10x1xf32> to vector<10x32xf32>
    %168 = arith.mulf %163, %167 : vector<10x32xf32>
    %169 = vector.broadcast %148 : vector<1x32xf32> to vector<10x32xf32>
    %170 = arith.mulf %168, %169 : vector<10x32xf32>
    %171 = vector.broadcast %150 : vector<1x32xf32> to vector<10x32xf32>
    %172 = arith.addf %170, %171 : vector<10x32xf32>
    %173 = arith.truncf %172 : vector<10x32xf32> to vector<10x32xbf16>
    %c0_76 = arith.constant 0 : index
    %c0_77 = arith.constant 0 : index
    %c0_78 = arith.constant 0 : index
    %174 = vector.load %arg20[%c0_76, %c0_77, %c0_78] : memref<1x32x128xbf16, #tpu.memory_space<vmem>>, vector<1x32x128xbf16>
    %175 = vector.shape_cast %174 : vector<1x32x128xbf16> to vector<32x128xbf16>
    %cst_79 = arith.constant dense<0.000000e+00> : vector<10x128xf32>
    %176 = tpu.matmul %173, %175, %cst_79 {dimension_numbers = #tpu.dot_dimension_numbers<[1], [0], [0], [1], [0, 0, 1, 1], [], []>} : vector<10x32xbf16>, vector<32x128xbf16>, vector<10x128xf32> -> vector<10x128xf32>
    %c0_80 = arith.constant 0 : index
    %c0_81 = arith.constant 0 : index
    %c0_82 = arith.constant 0 : index
    %177 = vector.load %arg21[%c0_80, %c0_81, %c0_82] : memref<1x1x128xf32, #tpu.memory_space<vmem>>, vector<1x1x128xf32>
    %178 = vector.shape_cast %177 : vector<1x1x128xf32> to vector<1x128xf32>
    %179 = vector.broadcast %178 : vector<1x128xf32> to vector<10x128xf32>
    %180 = arith.addf %176, %179 : vector<10x128xf32>
    %cst_83 = arith.constant 1.702000e+00 : f32
    %181 = vector.broadcast %cst_83 : f32 to vector<10x128xf32>
    %182 = arith.mulf %181, %180 : vector<10x128xf32>
    %183 = arith.negf %182 : vector<10x128xf32>
    %184 = math.exp %183 : vector<10x128xf32>
    %cst_84 = arith.constant 1.000000e+00 : f32
    %185 = vector.broadcast %cst_84 : f32 to vector<10x128xf32>
    %186 = arith.addf %185, %184 : vector<10x128xf32>
    %187 = arith.divf %185, %186 : vector<10x128xf32>
    %188 = arith.mulf %180, %187 : vector<10x128xf32>
    %189 = arith.truncf %188 : vector<10x128xf32> to vector<10x128xbf16>
    %c0_85 = arith.constant 0 : index
    %c0_86 = arith.constant 0 : index
    %c0_87 = arith.constant 0 : index
    %190 = vector.load %arg22[%c0_85, %c0_86, %c0_87] : memref<1x128x32xbf16, #tpu.memory_space<vmem>>, vector<1x128x32xbf16>
    %191 = vector.shape_cast %190 : vector<1x128x32xbf16> to vector<128x32xbf16>
    %cst_88 = arith.constant dense<0.000000e+00> : vector<10x32xf32>
    %192 = tpu.matmul %189, %191, %cst_88 {dimension_numbers = #tpu.dot_dimension_numbers<[1], [0], [0], [1], [0, 0, 1, 1], [], []>} : vector<10x128xbf16>, vector<128x32xbf16>, vector<10x32xf32> -> vector<10x32xf32>
    %c0_89 = arith.constant 0 : index
    %c0_90 = arith.constant 0 : index
    %c0_91 = arith.constant 0 : index
    %193 = vector.load %arg23[%c0_89, %c0_90, %c0_91] : memref<1x1x32xf32, #tpu.memory_space<vmem>>, vector<1x1x32xf32>
    %194 = vector.shape_cast %193 : vector<1x1x32xf32> to vector<1x32xf32>
    %195 = vector.broadcast %194 : vector<1x32xf32> to vector<10x32xf32>
    %196 = arith.addf %192, %195 : vector<10x32xf32>
    %197 = arith.addf %146, %196 : vector<10x32xf32>
    %c0_92 = arith.constant 0 : index
    %c0_93 = arith.constant 0 : index
    %198 = vector.load %arg29[%c0_92, %c0_93] : memref<10x32xf32, #tpu.memory_space<vmem>>, vector<10x32xf32>
    tpu.vector_store %arg29[%c0_92, %c0_93], %197 {strides = array<i32>} : memref<10x32xf32, #tpu.memory_space<vmem>>, vector<10x32xf32>,
    %c1_i32 = arith.constant 1 : i32
    %199 = arith.cmpi eq, %arg1, %c1_i32 : i32
    %200 = arith.extui %199 : i1 to i32
    %c0_i32_94 = arith.constant 0 : i32
    %201 = arith.cmpi ne, %200, %c0_i32_94 : i32
    scf.if %201 {
      %202 = vector.extract_strided_slice %197 {offsets = [0, 0], sizes = [1, 32], strides = [1, 1]} : vector<10x32xf32> to vector<1x32xf32>
      %c0_95 = arith.constant 0 : index
      %c0_96 = arith.constant 0 : index
      %203 = vector.load %arg30[%c0_95, %c0_96] : memref<10x32xf32, #tpu.memory_space<vmem>>, vector<1x32xf32>
      tpu.vector_store %arg30[%c0_95, %c0_96], %202 {strides = array<i32>} : memref<10x32xf32, #tpu.memory_space<vmem>>, vector<1x32xf32>,
      %204 = vector.extract_strided_slice %197 {offsets = [5, 0], sizes = [1, 32], strides = [1, 1]} : vector<10x32xf32> to vector<1x32xf32>
      %c1 = arith.constant 1 : index
      %c0_97 = arith.constant 0 : index
      %205 = vector.load %arg30[%c1, %c0_97] : memref<10x32xf32, #tpu.memory_space<vmem>>, vector<1x32xf32>
      tpu.vector_store %arg30[%c1, %c0_97], %204 {strides = array<i32>} : memref<10x32xf32, #tpu.memory_space<vmem>>, vector<1x32xf32>,
      %c0_98 = arith.constant 0 : index
      %c0_99 = arith.constant 0 : index
      %206 = vector.load %arg30[%c0_98, %c0_99] : memref<10x32xf32, #tpu.memory_space<vmem>>, vector<2x32xf32>
      %c0_100 = arith.constant 0 : index
      %c0_101 = arith.constant 0 : index
      %207 = vector.load %arg24[%c0_100, %c0_101] : memref<1x32xf32, #tpu.memory_space<vmem>>, vector<1x32xf32>
      %c0_102 = arith.constant 0 : index
      %c0_103 = arith.constant 0 : index
      %208 = vector.load %arg25[%c0_102, %c0_103] : memref<1x32xf32, #tpu.memory_space<vmem>>, vector<1x32xf32>
      %cst_104 = arith.constant dense<0.000000e+00> : vector<2xf32>
      %209 = vector.multi_reduction <add>, %206, %cst_104 [1] : vector<2x32xf32> to vector<2xf32>
      %210 = vector.shape_cast %209 : vector<2xf32> to vector<2x1xf32>
      %cst_105 = arith.constant 3.200000e+01 : f32
      %211 = vector.broadcast %cst_105 : f32 to vector<2x1xf32>
      %212 = arith.divf %210, %211 : vector<2x1xf32>
      %213 = vector.broadcast %212 : vector<2x1xf32> to vector<2x32xf32>
      %214 = arith.subf %206, %213 : vector<2x32xf32>
      %215 = arith.mulf %214, %214 : vector<2x32xf32>
      %cst_106 = arith.constant dense<0.000000e+00> : vector<2xf32>
      %216 = vector.multi_reduction <add>, %215, %cst_106 [1] : vector<2x32xf32> to vector<2xf32>
      %217 = vector.shape_cast %216 : vector<2xf32> to vector<2x1xf32>
      %cst_107 = arith.constant 3.200000e+01 : f32
      %218 = vector.broadcast %cst_107 : f32 to vector<2x1xf32>
      %219 = arith.divf %217, %218 : vector<2x1xf32>
      %220 = vector.broadcast %212 : vector<2x1xf32> to vector<2x32xf32>
      %221 = arith.subf %206, %220 : vector<2x32xf32>
      %cst_108 = arith.constant 9.99999974E-6 : f32
      %222 = vector.broadcast %cst_108 : f32 to vector<2x1xf32>
      %223 = arith.addf %219, %222 : vector<2x1xf32>
      %224 = math.rsqrt %223 : vector<2x1xf32>
      %225 = vector.broadcast %224 : vector<2x1xf32> to vector<2x32xf32>
      %226 = arith.mulf %221, %225 : vector<2x32xf32>
      %227 = vector.broadcast %207 : vector<1x32xf32> to vector<2x32xf32>
      %228 = arith.mulf %226, %227 : vector<2x32xf32>
      %229 = vector.broadcast %208 : vector<1x32xf32> to vector<2x32xf32>
      %230 = arith.addf %228, %229 : vector<2x32xf32>
      %231 = arith.truncf %230 : vector<2x32xf32> to vector<2x32xbf16>
      %c0_109 = arith.constant 0 : index
      %c0_110 = arith.constant 0 : index
      %232 = vector.load %arg26[%c0_109, %c0_110] : memref<32x32xbf16, #tpu.memory_space<vmem>>, vector<32x32xbf16>
      %cst_111 = arith.constant dense<0.000000e+00> : vector<2x32xf32>
      %233 = tpu.matmul %231, %232, %cst_111 {dimension_numbers = #tpu.dot_dimension_numbers<[1], [0], [0], [1], [0, 0, 1, 1], [], []>} : vector<2x32xbf16>, vector<32x32xbf16>, vector<2x32xf32> -> vector<2x32xf32>
      %234 = arith.truncf %233 : vector<2x32xf32> to vector<2x32xbf16>
      %c0_112 = arith.constant 0 : index
      %c0_113 = arith.constant 0 : index
      %235 = vector.load %arg27[%c0_112, %c0_113] : memref<32x128xbf16, #tpu.memory_space<vmem>>, vector<32x128xbf16>
      %cst_114 = arith.constant dense<0.000000e+00> : vector<2x128xf32>
      %236 = tpu.matmul %234, %235, %cst_114 {dimension_numbers = #tpu.dot_dimension_numbers<[1], [0], [0], [1], [0, 0, 1, 1], [], []>} : vector<2x32xbf16>, vector<32x128xbf16>, vector<2x128xf32> -> vector<2x128xf32>
      %c0_115 = arith.constant 0 : index
      %c0_116 = arith.constant 0 : index
      %c0_117 = arith.constant 0 : index
      %237 = vector.load %arg28[%c0_115, %c0_116, %c0_117] : memref<1x2x128xf32, #tpu.memory_space<vmem>>, vector<1x2x128xf32>
      %238 = vector.shape_cast %237 : vector<1x2x128xf32> to vector<2x128xf32>
      %239 = vector.shape_cast %236 : vector<2x128xf32> to vector<1x2x128xf32>
      tpu.vector_store %arg28[%c0_115, %c0_116, %c0_117], %239 {strides = array<i32>} : memref<1x2x128xf32, #tpu.memory_space<vmem>>, vector<1x2x128xf32>,
    } else {
    }
    return
  }
  func.func @transform_0(%arg0: i32, %arg1: i32) -> (i32, i32, i32) {
    %c0_i32 = arith.constant 0 : i32
    %c0_i32_0 = arith.constant 0 : i32
    %c0_i32_1 = arith.constant 0 : i32
    return %arg0, %c0_i32, %c0_i32_0 : i32, i32, i32
  }
  func.func @transform_1(%arg0: i32, %arg1: i32) -> (i32, i32) {
    %c0_i32 = arith.constant 0 : i32
    %c0_i32_0 = arith.constant 0 : i32
    %c0_i32_1 = arith.constant 0 : i32
    return %c0_i32, %c0_i32_0 : i32, i32
  }
  func.func @transform_2(%arg0: i32, %arg1: i32) -> (i32, i32) {
    %c0_i32 = arith.constant 0 : i32
    %c0_i32_0 = arith.constant 0 : i32
    %c0_i32_1 = arith.constant 0 : i32
    return %c0_i32, %c0_i32_0 : i32, i32
  }
  func.func @transform_3(%arg0: i32, %arg1: i32) -> (i32, i32) {
    %c0_i32 = arith.constant 0 : i32
    %c0_i32_0 = arith.constant 0 : i32
    %c0_i32_1 = arith.constant 0 : i32
    return %c0_i32, %c0_i32_0 : i32, i32
  }
  func.func @transform_4(%arg0: i32, %arg1: i32) -> (i32, i32) {
    %c0_i32 = arith.constant 0 : i32
    %c0_i32_0 = arith.constant 0 : i32
    %c0_i32_1 = arith.constant 0 : i32
    return %c0_i32, %c0_i32_0 : i32, i32
  }
  func.func @transform_5(%arg0: i32, %arg1: i32) -> (i32, i32) {
    %c0_i32 = arith.constant 0 : i32
    %c0_i32_0 = arith.constant 0 : i32
    %c0_i32_1 = arith.constant 0 : i32
    return %c0_i32, %c0_i32_0 : i32, i32
  }
  func.func @transform_6(%arg0: i32, %arg1: i32) -> (i32, i32, i32) {
    %c0_i32 = arith.constant 0 : i32
    %c0_i32_0 = arith.constant 0 : i32
    %c0_i32_1 = arith.constant 0 : i32
    return %arg1, %c0_i32, %c0_i32_0 : i32, i32, i32
  }
  func.func @transform_7(%arg0: i32, %arg1: i32) -> (i32, i32, i32) {
    %c0_i32 = arith.constant 0 : i32
    %c0_i32_0 = arith.constant 0 : i32
    %c0_i32_1 = arith.constant 0 : i32
    return %arg1, %c0_i32, %c0_i32_0 : i32, i32, i32
  }
  func.func @transform_8(%arg0: i32, %arg1: i32) -> (i32, i32, i32) {
    %c0_i32 = arith.constant 0 : i32
    %c0_i32_0 = arith.constant 0 : i32
    %c0_i32_1 = arith.constant 0 : i32
    return %arg1, %c0_i32, %c0_i32_0 : i32, i32, i32
  }
  func.func @transform_9(%arg0: i32, %arg1: i32) -> (i32, i32, i32) {
    %c0_i32 = arith.constant 0 : i32
    %c0_i32_0 = arith.constant 0 : i32
    %c0_i32_1 = arith.constant 0 : i32
    return %arg1, %c0_i32, %c0_i32_0 : i32, i32, i32
  }
  func.func @transform_10(%arg0: i32, %arg1: i32) -> (i32, i32, i32) {
    %c0_i32 = arith.constant 0 : i32
    %c0_i32_0 = arith.constant 0 : i32
    %c0_i32_1 = arith.constant 0 : i32
    return %arg1, %c0_i32, %c0_i32_0 : i32, i32, i32
  }
  func.func @transform_11(%arg0: i32, %arg1: i32) -> (i32, i32, i32) {
    %c0_i32 = arith.constant 0 : i32
    %c0_i32_0 = arith.constant 0 : i32
    %c0_i32_1 = arith.constant 0 : i32
    return %arg1, %c0_i32, %c0_i32_0 : i32, i32, i32
  }
  func.func @transform_12(%arg0: i32, %arg1: i32) -> (i32, i32, i32) {
    %c0_i32 = arith.constant 0 : i32
    %c0_i32_0 = arith.constant 0 : i32
    %c0_i32_1 = arith.constant 0 : i32
    return %arg1, %c0_i32, %c0_i32_0 : i32, i32, i32
  }
  func.func @transform_13(%arg0: i32, %arg1: i32) -> (i32, i32, i32) {
    %c0_i32 = arith.constant 0 : i32
    %c0_i32_0 = arith.constant 0 : i32
    %c0_i32_1 = arith.constant 0 : i32
    return %arg1, %c0_i32, %c0_i32_0 : i32, i32, i32
  }
  func.func @transform_14(%arg0: i32, %arg1: i32) -> (i32, i32, i32) {
    %c0_i32 = arith.constant 0 : i32
    %c0_i32_0 = arith.constant 0 : i32
    %c0_i32_1 = arith.constant 0 : i32
    return %arg1, %c0_i32, %c0_i32_0 : i32, i32, i32
  }
  func.func @transform_15(%arg0: i32, %arg1: i32) -> (i32, i32, i32) {
    %c0_i32 = arith.constant 0 : i32
    %c0_i32_0 = arith.constant 0 : i32
    %c0_i32_1 = arith.constant 0 : i32
    return %arg1, %c0_i32, %c0_i32_0 : i32, i32, i32
  }
  func.func @transform_16(%arg0: i32, %arg1: i32) -> (i32, i32, i32) {
    %c0_i32 = arith.constant 0 : i32
    %c0_i32_0 = arith.constant 0 : i32
    %c0_i32_1 = arith.constant 0 : i32
    return %arg1, %c0_i32, %c0_i32_0 : i32, i32, i32
  }
  func.func @transform_17(%arg0: i32, %arg1: i32) -> (i32, i32, i32) {
    %c0_i32 = arith.constant 0 : i32
    %c0_i32_0 = arith.constant 0 : i32
    %c0_i32_1 = arith.constant 0 : i32
    return %arg1, %c0_i32, %c0_i32_0 : i32, i32, i32
  }
  func.func @transform_18(%arg0: i32, %arg1: i32) -> (i32, i32, i32) {
    %c0_i32 = arith.constant 0 : i32
    %c0_i32_0 = arith.constant 0 : i32
    %c0_i32_1 = arith.constant 0 : i32
    return %arg1, %c0_i32, %c0_i32_0 : i32, i32, i32
  }
  func.func @transform_19(%arg0: i32, %arg1: i32) -> (i32, i32, i32) {
    %c0_i32 = arith.constant 0 : i32
    %c0_i32_0 = arith.constant 0 : i32
    %c0_i32_1 = arith.constant 0 : i32
    return %arg1, %c0_i32, %c0_i32_0 : i32, i32, i32
  }
  func.func @transform_20(%arg0: i32, %arg1: i32) -> (i32, i32, i32) {
    %c0_i32 = arith.constant 0 : i32
    %c0_i32_0 = arith.constant 0 : i32
    %c0_i32_1 = arith.constant 0 : i32
    return %arg1, %c0_i32, %c0_i32_0 : i32, i32, i32
  }
  func.func @transform_21(%arg0: i32, %arg1: i32) -> (i32, i32, i32) {
    %c0_i32 = arith.constant 0 : i32
    %c0_i32_0 = arith.constant 0 : i32
    %c0_i32_1 = arith.constant 0 : i32
    return %arg1, %c0_i32, %c0_i32_0 : i32, i32, i32
  }
  func.func @transform_22(%arg0: i32, %arg1: i32) -> (i32, i32) {
    %c0_i32 = arith.constant 0 : i32
    %c0_i32_0 = arith.constant 0 : i32
    %c0_i32_1 = arith.constant 0 : i32
    return %c0_i32, %c0_i32_0 : i32, i32
  }
  func.func @transform_23(%arg0: i32, %arg1: i32) -> (i32, i32) {
    %c0_i32 = arith.constant 0 : i32
    %c0_i32_0 = arith.constant 0 : i32
    %c0_i32_1 = arith.constant 0 : i32
    return %c0_i32, %c0_i32_0 : i32, i32
  }
  func.func @transform_24(%arg0: i32, %arg1: i32) -> (i32, i32) {
    %c0_i32 = arith.constant 0 : i32
    %c0_i32_0 = arith.constant 0 : i32
    %c0_i32_1 = arith.constant 0 : i32
    return %c0_i32, %c0_i32_0 : i32, i32
  }
  func.func @transform_25(%arg0: i32, %arg1: i32) -> (i32, i32) {
    %c0_i32 = arith.constant 0 : i32
    %c0_i32_0 = arith.constant 0 : i32
    %c0_i32_1 = arith.constant 0 : i32
    return %c0_i32, %c0_i32_0 : i32, i32
  }
  func.func @transform_26(%arg0: i32, %arg1: i32) -> (i32, i32, i32) {
    %c0_i32 = arith.constant 0 : i32
    %c0_i32_0 = arith.constant 0 : i32
    %c0_i32_1 = arith.constant 0 : i32
    return %arg0, %c0_i32, %c0_i32_0 : i32, i32, i32
  }
}

</mosaic_0001>

<bundles_post_ra>
// kernel: tile.9
= control target key start
LH: loop header
LB: loop body
LE: loop exit
PB: predicated region body
PF: predicated region fallthrough
CT: control target
= control target key end

     0   :  { %vm3_vm0 = vcmask 261120   ;;  %s34_s0 = inlined_call_operand.vmem [shape: f32[2,5,32], index: 0, kind: input, shape index: {}]   ;;  %s35_s1 = inlined_call_operand.vmem [shape: f32[10,32], index: 1, kind: output, shape index: {}]  }
   0x1   :  { %v2_v0 = vld [vmem:[%s34_s0] sm:$0x1f]   ;;  %v10_v1 = vld [vmem:[%s34_s0 + $0x8] sm:$0x1f]  }
   0x2   :  { %4 = vst.msk [vmem:[%s35_s1] sm:$0x1f] %vm3_vm0, %v2_v0   ;;  %11 = vst.msk [vmem:[%s35_s1 + $0x5] sm:$0x1f] %vm3_vm0, %v10_v1  }

// kernel: clip4aes_forward.1
= control target key start
LH: loop header
LB: loop body
LE: loop exit
PB: predicated region body
PF: predicated region fallthrough
CT: control target
= control target key end

     0   :  { %s3967_s0 = inlined_call_operand.vmem [shape: f32[2,10,192], index: 0, kind: input, shape index: {}]   ;;  %s3968_s1 = inlined_call_operand.vmem [shape: f32[10,10], index: 1, kind: input, shape index: {}]   ;;  %s3969_s2 = inlined_call_operand.vmem [shape: bf16[192,32], index: 2, kind: input, shape index: {}]   ;;  %s3970_s3 = inlined_call_operand.vmem [shape: f32[10,32], index: 3, kind: input, shape index: {}]   ;;  %s3971_s4 = inlined_call_operand.vmem [shape: f32[1,32], index: 4, kind: input, shape index: {}]   ;;  %s3972_s5 = inlined_call_operand.vmem [shape: f32[1,32], index: 5, kind: input, shape index: {}]   ;;  %s3973_s6 = inlined_call_operand.vmem [shape: f32[2,1,32], index: 6, kind: input, shape index: {}]   ;;  %s3974_s7 = inlined_call_operand.vmem [shape: f32[2,1,32], index: 7, kind: input, shape index: {}]   ;;  %s3975_s8 = inlined_call_operand.vmem [shape: bf16[2,32,32], index: 8, kind: input, shape index: {}]   ;;  %s3976_s9 = inlined_call_operand.vmem [shape: f32[2,1,32], index: 9, kind: input, shape index: {}]   ;;  %s3977_s10 = inlined_call_operand.vmem [shape: bf16[2,32,32], index: 10, kind: input, shape index: {}]   ;;  %s3978_s11 = inlined_call_operand.vmem [shape: f32[2,1,32], index: 11, kind: input, shape index: {}]   ;;  %s3979_s12 = inlined_call_operand.vmem [shape: bf16[2,32,32], index: 12, kind: input, shape index: {}]   ;;  %s3980_s13 = inlined_call_operand.vmem [shape: f32[2,1,32], index: 13, kind: input, shape index: {}]   ;;  %s3981_s14 = inlined_call_operand.vmem [shape: bf16[2,32,32], index: 14, kind: input, shape index: {}]   ;;  %s3982_s15 = inlined_call_operand.vmem [shape: f32[2,1,32], index: 15, kind: input, shape index: {}]   ;;  %s3983_s16 = inlined_call_operand.vmem [shape: f32[2,1,32], index: 16, kind: input, shape index: {}]   ;;  %s3984_s17 = inlined_call_operand.vmem [shape: f32[2,1,32], index: 17, kind: input, shape index: {}]   ;;  %s3985_s18 = inlined_call_operand.vmem [shape: bf16[2,32,128], index: 18, kind: input, shape index: {}]   ;;  %s3986_s19 = inlined_call_operand.vmem [shape: f32[2,1,128], index: 19, kind: input, shape index: {}]   ;;  %s3987_s20 = inlined_call_operand.vmem [shape: bf16[2,128,32], index: 20, kind: input, shape index: {}]   ;;  %s3988_s21 = inlined_call_operand.vmem [shape: f32[2,1,32], index: 21, kind: input, shape index: {}]   ;;  %s3989_s22 = inlined_call_operand.vmem [shape: f32[1,32], index: 22, kind: input, shape index: {}]   ;;  %s3990_s23 = inlined_call_operand.vmem [shape: f32[1,32], index: 23, kind: input, shape index: {}]   ;;  %s3991_s24 = inlined_call_operand.vmem [shape: bf16[32,32], index: 24, kind: input, shape index: {}]   ;;  %s3992_s25 = inlined_call_operand.vmem [shape: bf16[32,128], index: 25, kind: input, shape index: {}]   ;;  %s3993_s26 = inlined_call_operand.hbm [shape: f32[2,2,128], index: 26, kind: output, shape index: {}]  }
   0x1   :  { %4017 = sst [smem:[#allocation22_spill]] %s3967_s0 }
   0x2   :  { %4018 = sst [smem:[#allocation23_spill]] %s3968_s1 }
   0x3   :  { %4019 = sst [smem:[#allocation24_spill]] %s3969_s2 }
   0x4   :  { %4020 = sst [smem:[#allocation25_spill]] %s3970_s3 }
   0x5   :  { %4021 = sst [smem:[#allocation26_spill]] %s3971_s4 }
   0x6   :  { %4022 = sst [smem:[#allocation27_spill]] %s3972_s5 }
   0x7   :  { %4023 = sst [smem:[#allocation28_spill]] %s3973_s6 }
   0x8   :  { %4024 = sst [smem:[#allocation29_spill]] %s3974_s7 }
   0x9   :  { %4025 = sst [smem:[#allocation30_spill]] %s3975_s8 }
   0xa   :  { %4026 = sst [smem:[#allocation31_spill]] %s3976_s9 }
   0xb   :  { %4027 = sst [smem:[#allocation32_spill]] %s3977_s10 }
   0xc   :  { %4028 = sst [smem:[#allocation33_spill]] %s3979_s12 }
   0xd   :  { %4029 = sst [smem:[#allocation34_spill]] %s3981_s14 }
   0xe   :  { %4030 = sst [smem:[#allocation35_spill]] %s3989_s22 }
   0xf   :  { %4031 = sst [smem:[#allocation36_spill]] %s3990_s23 }
  0x10   :  { %4032 = sst [smem:[#allocation37_spill]] %s3991_s24 }
  0x11   :  { %4033 = sst [smem:[#allocation38_spill]] %s3992_s25 }
  0x12   :  { %4034 = sst [smem:[#allocation39_spill]] %s3993_s26 }
  0x13   :  { %31 = vsyncpa [#allocation5], 0 }
  0x14   :  { %33 = vsyncpa [#allocation5 + $0x1], 0  ;;  %s3451_s27 = smov 0   ;;  %s3453_s3 = smov 0  }
  0x15   :  { %s3455_s7 = smov 0   ;;  %s3457_s28 = smov 0  }
  0x16   :  { %s3459_s8 = smov 0   ;;  %s3461_s4 = smov 0  }
  0x17   :  { %s3463_s29 = smov 0   ;;  %s3465_s0 = smov 0  }
  0x18 LB: > { %4035 = sst [smem:[#allocation7_spill]] %s3274_s27  ;;  %s2769_s9 = sadd.s32 4294967295, %s3302_s0   ;;  %s3302_s0 = sphi %s3465_s0, %s39_s0   ;;  %s3298_s29 = sphi %s3463_s29, %s4101_s29   ;;  %s3294_s4 = sphi %s3461_s4, %s4100_s4   ;;  %s3290_s8 = sphi %s3459_s8, %s4099_s8   ;;  %s3286_s28 = sphi %s3457_s28, %s4098_s28   ;;  %s3282_s7 = sphi %s3455_s7, %s4097_s7   ;;  %s3278_s3 = sphi %s3453_s3, %s4096_s3   ;;  %s3274_s27 = sphi %s3451_s27, %s4095_s27  }
  0x19   : > { %4036 = sst [smem:[#allocation8_spill]] %s3278_s3  ;;  %s2770_s30 = sadd.s32 4294967294, %s3302_s0  }
  0x1a   : > { %4037 = sst [smem:[#allocation9_spill]] %s3282_s7  ;;  %s48_s2 = sadd.s32 1, %s3294_s4 }
  0x1b   : > { %4038 = sst [smem:[#allocation10_spill]] %s3286_s28  ;;  %p49_p0 = scmp.ge.s32.totalorder %s48_s2, 2 }
  0x1c   : > { %4039 = sst [smem:[#allocation11_spill]] %s3290_s8  ;;  %s51_s5 = sadd.s32 1, %s3298_s29 }
  0x1d   : > { %4040 = sst [smem:[#allocation12_spill]] %s3294_s4  ;;  %p699_p1 = scmp.ne.s32.totalorder %s3282_s7, %s3278_s3 }
  0x1e   : > { %4041 = sst [smem:[#allocation13_spill]] %s3298_s29  ;;  %p700_p2 = scmp.eq.s32.totalorder %s2769_s9, 3 }
  0x1f   : > { %4042 = sst [smem:[#allocation14_spill]] %s3302_s0  ;;  %s4103_s2 = smov (%p49_p0, %s48_s2), 0 }
  0x20   : > { %4043 = sst [smem:[#allocation15_spill]] %s4103_s2  ;;  %s4105_s5 = smov (!%p49_p0, %s51_s5), %s3298_s29 }
  0x21   : > { %p3500_p3 = por %p700_p2, %p699_p1  ;;  %p705_p4 = scmp.ne.s32.totalorder %s3278_s3, %s3274_s27 }
  0x22   : > { %p53_p5 = scmp.ge.s32.totalorder %s4105_s5, 2  ;;  %p706_p6 = scmp.eq.s32.totalorder %s2770_s30, 3 }
  0x23   : > { %s4044_s10 = scalar_select %p3500_p3, 1, 0 }
  0x24   : > { %p2773_p7 = scmp.ge.s32.totalorder %s3302_s0, 1  ;;  %p867_p8 = scmp.lt.s32.totalorder %s3302_s0, 5 }
  0x25   : > { %4045 = sst [smem:[#allocation16_spill]] %s4044_s10  ;;  %s4107_s5 = smov (%p53_p5, %s4105_s5), 0 }
  0x26   : > { %4046 = sst [smem:[#allocation17_spill]] %s4107_s5  ;;  %p3510_p9 = por %p706_p6, %p705_p4 }
  0x27   : > { %p868_p10 = pnand %p2773_p7, %p867_p8  ;;  %s686_s1 = ssub.s32 %s3298_s29, %s4107_s5 }
  0x28   : > { %s4047_s6 = scalar_select %p3510_p9, 1, 0 }
  0x29   : > { %s689_s9 = sadd.s32 1, %s3282_s7  ;;  %p687_p11 = scmp.eq.s32.totalorder %s686_s1, 0 }
  0x2a   : > { %4048 = sst [smem:[#allocation18_spill]] %s4047_s6  ;;  %871 = sbr.rel (%p868_p10) target bundleno = 4035 (0xfc3), region = 124 }
  0x2b   : > { %s3518_s2 = scalar_select %p687_p11, %s3282_s7, %s689_s9  }
  0x2d   : > { %4049 = sst [smem:[#allocation19_spill]] %s3518_s2 }
  0x31   : > { %s4002_s30 = sand.u32 1, %s3278_s3   ;;  %p997_p12 = scmp.lt.s32.totalorder %s3290_s8, 1 }
  0x32   : > { %s3524_s4 = sshll.u32 %s4002_s30, 1  ;;  %p1002_p13 = scmp.lt.s32.totalorder %s3286_s28, 1 }
  0x33   : > { %s998_s6 = scalar_select %p997_p12, %s3290_s8, 1 }
  0x34   : > { %s3529_s27 = scalar_select %p1002_p13, %s3286_s28, 1 }
  0x35   : > { %s2861_s1 = sshll.u32 %s998_s6, 5  ;;  %s4050_s29 = sld [smem:[#allocation22_spill]] }
  0x36   : > { %s2862_s22 = sshll.u32 %s3529_s27, 4  ;;  %s4054_s6 = sld [smem:[#allocation30_spill]] }
  0x37   : > { %s4057_s2 = sld [smem:[#allocation32_spill]]  ;;  %s4058_s12 = sld [smem:[#allocation33_spill]] }
  0x38   : > { %s4059_s14 = sld [smem:[#allocation34_spill]]  ;;  %s996_s23 = scalar_lea.vmem [#allocation4], %s3524_s4 }
  0x39   : > { %s4060_s10 = sld [smem:[#allocation10_spill]] }
  0x3b   : > { %s3534_s30 = scalar_lea.vmem %s4050_s29, %s2861_s1 }
  0x3c   : > { %4051 = sst [smem:[#allocation20_spill]] %s3534_s30  ;;  %s3548_s28 = scalar_lea.vmem %s4054_s6, %s2862_s22 }
  0x3d   : > { %4055 = sst [smem:[#allocation21_spill]] %s3548_s28  ;;  %s3557_s0 = scalar_lea.vmem %s4057_s2, %s2862_s22 }
  0x3e   : > { %s3566_s24 = scalar_lea.vmem %s4058_s12, %s2862_s22  ;;  %s3575_s1 = scalar_lea.vmem %s4059_s14, %s2862_s22 }
  0x3f   : > { %s3592_s6 = scalar_lea.vmem %s3985_s18, %s2862_s22  ;;  %s1053_s28 = scalar_lea.vmem %s3986_s19, %s3529_s27 }
  0x40   : > { %s2867_s14 = sshll.u32 %s3529_s27, 6  ;;  %s1061_s2 = scalar_lea.vmem %s3988_s21, %s3529_s27 }
  0x41   : > { %s3606_s8 = scalar_lea.vmem %s3987_s20, %s2867_s14  ;;  %p2789_p0 = scmp.ne.s32.totalorder %s4060_s10, 0 }
  0x42   : > { %s4061_s25 = sld [smem:[#allocation24_spill]] (!%p2789_p0)  ;;  %s4062_s9 = sld [smem:[#allocation20_spill]] (!%p2789_p0)  ;;  %v3304_v1 = vmov (!%p2789_p0), 0   ;;  %vm1171_vm0 = vcmask (!%p2789_p0), 523264   ;;  %vm1218_vm1 = vcmask (!%p2789_p0), 261120   ;;  %vm1222_vm2 = vcmask (!%p2789_p0), 254976  }
  0x43   : > { %1066 = sbr.rel (%p2789_p0) target bundleno = 652 (0x28c), region = 128  ;;  %1175 = vmatprep.subr.bf16.mxu0 (!%p2789_p0), %v3304_v1  ;;  %s4063_s7 = sld [smem:[#allocation25_spill]] (!%p2789_p0) }
  0x44   : > { %s4065_s22 = sld [smem:[#allocation26_spill]] (!%p2789_p0)  ;;  %s4066_s14 = sld [smem:[#allocation27_spill]] (!%p2789_p0) }
  0x48   : > { %v3120_v0 = vld [vmem:[%s4061_s25] sm:$0xff] (!%p2789_p0)   ;;  %v3121_v2 = vld [vmem:[%s4061_s25 + $0x8] sm:$0xff] (!%p2789_p0)   ;;  %v3122_v3 = vld [vmem:[%s4061_s25 + $0x10] sm:$0xff] (!%p2789_p0)  }
  0x49   : > { %1176 = vmatpush1.bf16.msra.mxu0 (!%p2789_p0), %v3120_v0  ;;  %v3123_v4 = vld [vmem:[%s4061_s25 + $0x18] sm:$0xff] (!%p2789_p0)   ;;  %v1068_v5 = vld [vmem:[%s4062_s9 + $0x8] sm:$0xff] (!%p2789_p0)  ;;  %v3124_v8 = vld [vmem:[%s4061_s25 + $0x20] sm:$0xff] (!%p2789_p0)   ;;  %s4064_s26 = smov (!%p2789_p0), %s4063_s7 }
  0x4a   : > { %1177 = vmatprep.subr.bf16.mxu0 %v3304_v1  ;;  %v1070_v6 = vld [vmem:[%s4062_s9 + $0x18] sm:$0x3]  ;;  %v3125_v9 = vld [vmem:[%s4061_s25 + $0x28] sm:$0xff]   ;;  %v3126_v10 = vld [vmem:[%s4061_s25 + $0x30] sm:$0xff]  }
  0x4b   : > { %v1072_v7 = vpack.c.bf16 %v1070_v6, %v1068_v5  ;;  %v3127_v11 = vld [vmem:[%s4061_s25 + $0x38] sm:$0xff]   ;;  %v3128_v12 = vld [vmem:[%s4061_s25 + $0x40] sm:$0xff]   ;;  %v3129_v13 = vld [vmem:[%s4061_s25 + $0x48] sm:$0xff]  }
  0x4c   : > { %v3130_v14 = vld [vmem:[%s4061_s25 + $0x50] sm:$0xff]   ;;  %v3131_v15 = vld [vmem:[%s4061_s25 + $0x58] sm:$0xff]   ;;  %v1067_v16 = vld [vmem:[%s4062_s9] sm:$0xff] }
  0x4d   : > { %1178 = vmatpush1.bf16.msra.mxu0 %v3121_v2  ;;  %2802 = vmatprep.mubr.msk.bf16.mxu0 %vm1171_vm0, %v1072_v7  ;;  %v1069_v17 = vld [vmem:[%s4062_s9 + $0x10] sm:$0x3]  ;;  %v1097_v19 = vld [vmem:[%s4063_s7] sm:$0xff]  ;;  %v1098_v21 = vld [vmem:[%s4064_s26 + $0x8] sm:$0x3] }
  0x4e   : > { %1179 = vmatprep.subr.bf16.mxu0 %v3304_v1  ;;  %v1071_v18 = vpack.c.bf16 %v1069_v17, %v1067_v16  ;;  %v2803_v46 = vld [vmem:[%s4065_s22] ss:$0 sm:$0xff] }
  0x4f   : > { %v2804_v48 = vld [vmem:[%s4066_s14] ss:$0 sm:$0xff] }
  0x51   : > { %1180 = vmatpush1.bf16.msra.mxu0 %v3122_v3 }
  0x52   : > { %1181 = vmatprep.subr.bf16.mxu0 %v3304_v1 }
  0x55   : > { %1182 = vmatpush1.bf16.msra.mxu0 %v3123_v4 }
  0x56   : > { %1183 = vmatprep.subr.bf16.mxu0 %v3304_v1 }
  0x59   : > { %1184 = vmatpush1.bf16.msra.mxu0 %v3124_v8 }
  0x5a   : > { %1185 = vmatprep.subr.bf16.mxu0 %v3304_v1 }
  0x5d   : > { %1186 = vmatpush1.bf16.msra.mxu0 %v3125_v9 }
  0x5e   : > { %1187 = vmatprep.subr.bf16.mxu0 %v3304_v1 }
  0x61   : > { %1188 = vmatpush1.bf16.msra.mxu0 %v3126_v10 }
  0x62   : > { %1189 = vmatprep.subr.bf16.mxu0 %v3304_v1 }
  0x65   : > { %1190 = vmatpush1.bf16.msra.mxu0 %v3127_v11 }
  0x66   : > { %1191 = vmatprep.subr.bf16.mxu0 %v3304_v1 }
  0x69   : > { %1192 = vmatpush1.bf16.msra.mxu0 %v3128_v12 }
  0x6a   : > { %1193 = vmatprep.subr.bf16.mxu0 %v3304_v1 }
  0x6d   : > { %1194 = vmatpush1.bf16.msra.mxu0 %v3129_v13 }
  0x6e   : > { %1195 = vmatprep.subr.bf16.mxu0 %v3304_v1 }
  0x71   : > { %1196 = vmatpush1.bf16.msra.mxu0 %v3130_v14 }
  0x72   : > { %1197 = vmatprep.subr.bf16.mxu0 %v3304_v1 }
  0x75   : > { %1198 = vmatpush1.bf16.msra.mxu0 %v3131_v15 }
  0x78   : > { %1208 = vmatmul.mubr.bf16.vlgmr.msra.gmra.mrb[0].mxu0 %v1071_v18 }
 0x14b   : > { %v1209_v20 = vpop.f32.mrb[0].mxu0 }
 0x14c   : > { %v1210_v22 = vadd.f32 %v1209_v20, %v1097_v19  ;;  %v1211_v23 = vpop.f32.mrb[1].mxu0 }
 0x14d   : > { %v1212_v24 = vpop.f32.mrb[2].mxu0 }
 0x14e   : > { %v1213_v25 = vadd.f32 %v1212_v24, %v1098_v21  ;;  %v1214_v26 = vpop.f32.mrb[3].mxu0  ;;  %v1219_v27 = vsel %vm1218_vm1, %v1210_v22, 0.0 }
 0x14f   : > { %1220 = vadd.xlane.f32.xlu0 %v1219_v27 }
 0x150   : > { %v1223_v28 = vsel %vm1222_vm2, %v1213_v25, 0.0 }
 0x153   : > { %1224 = vadd.xlane.f32.xlu0 %v1223_v28 }
 0x1dc   : > { %v1221_v29 = vpop.xlane.xlu0 %1220 }
 0x1dd   : > { %v1227_v30 = vmul.f32 0.03125, %v1221_v29 }
 0x1df   : > { %v1229_v31 = vsub.f32 %v1210_v22, %v1227_v30 }
 0x1e0   : > { %v1225_v32 = vpop.xlane.xlu0 %1224 }
 0x1e1   : > { %v1228_v33 = vmul.f32 0.03125, %v1225_v32  ;;  %v1231_v34 = vmul.f32 %v1229_v31, %v1229_v31 }
 0x1e3   : > { %v1230_v35 = vsub.f32 %v1213_v25, %v1228_v33  ;;  %v1233_v36 = vsel %vm1218_vm1, %v1231_v34, 0.0 }
 0x1e4   : > { %1234 = vadd.xlane.f32.xlu1 %v1233_v36 }
 0x1e5   : > { %v1232_v37 = vmul.f32 %v1230_v35, %v1230_v35 }
 0x1e7   : > { %v1236_v38 = vsel %vm1222_vm2, %v1232_v37, 0.0 }
 0x1e8   : > { %1237 = vadd.xlane.f32.xlu1 %v1236_v38 }
 0x271   : > { %v1235_v39 = vpop.xlane.xlu1 %1234 }
 0x272   : > { %v1239_v40 = vmul.f32 0.03125, %v1235_v39 }
 0x274   : > { %v1241_v41 = vadd.f32 1e-05, %v1239_v40 }
 0x275   : > { %v1238_v42 = vpop.xlane.xlu1 %1237 }
 0x276   : > { %3132 = vrsqrt.f32 %v1241_v41  ;;  %v1240_v43 = vmul.f32 0.03125, %v1238_v42 }
 0x278   : > { %v1242_v44 = vadd.f32 1e-05, %v1240_v43 }
 0x27a   : > { %3134 = vrsqrt.f32 %v1242_v44 }
 0x280   : > { %v3133_v45 = vpop.eup %3132 }
 0x281   : > { %v1245_v47 = vmul.f32 %v3133_v45, %v1229_v31 }
 0x283   : > { %v1253_v49 = vmul.f32 %v2803_v46, %v1245_v47 }
 0x284   : > { %v3135_v50 = vpop.eup %3134 }
 0x285   : > { %v1261_v51 = vadd.f32 %v2804_v48, %v1253_v49  ;;  %v1246_v52 = vmul.f32 %v3135_v50, %v1230_v35 }
 0x287   : > { %1263 = vst.msk [vmem:[#allocation2] sm:$0xff] %vm1218_vm1, %v1261_v51  ;;  %v1254_v53 = vmul.f32 %v2803_v46, %v1246_v52 }
 0x289   : > { %v1262_v54 = vadd.f32 %v2804_v48, %v1254_v53 }
 0x28b   : > { %1264 = vst.msk [vmem:[#allocation2 + $0x8] sm:$0x3] %vm1222_vm2, %v1262_v54 }
 0x28c PF: > { %vm1269_vm3 = vcmask 261120   ;;  %vm1273_vm4 = vcmask 254976   ;;  %s4067_s30 = sld [smem:[#allocation21_spill]]  ;;  %v3305_v6 = vmov 0.0   ;;  %vm3306_vm5 = vmmov 0   ;;  %s4068_s10 = sld [smem:[#allocation28_spill]] }
 0x28d   : > { %2914 = vmatprep.subr.bf16.mxu0 %v3305_v6  ;;  %2938 = vmatprep.subr.bf16.mxu1 %v3305_v6  ;;  %s4070_s5 = sld [smem:[#allocation29_spill]]  ;;  %v3138_v24 = vld [vmem:[%s3557_s0] sm:$0xff]   ;;  %v3139_v26 = vld [vmem:[%s3557_s0 + $0x8] sm:$0xff]   ;;  %vm1515_vm6 = vcmask 64512   ;;  %s3308_s12 = smov 112   ;;  %vm1591_vm7 = vcmask 1044480  }
 0x28e   : > { %v3668_v55 = vld [vmem:[#allocation2] sm:$0xff]  ;;  %2918 = vmatprep.mubr.msk.bf16.mxu0 %vm3306_vm5, %v3305_v6  ;;  %2940 = vmatprep.mubr.msk.bf16.mxu1 %vm3306_vm5, %v3305_v6  ;;  %v3141_v28 = vld [vmem:[%s3566_s24 + $0x8] sm:$0xff]   ;;  %s3309_s0 = smov 104   ;;  %vm1563_vm8 = vcmask 80896   ;;  %vm1567_vm9 = vcmask 74752   ;;  %vm1637_vm10 = vcmask 58368   ;;  %s4080_s3 = scalar_lea.vmem %s3984_s17, %s3529_s27 }
 0x28f   : > { %v1270_v57 = vsel %vm1269_vm3, %v3668_v55, 0.0  ;;  %v3140_v27 = vld [vmem:[%s3566_s24] sm:$0xff]   ;;  %s3307_s24 = smov 120   ;;  %s3312_s22 = smov 24   ;;  %vm1773_vm11 = vcmask 130112   ;;  %vm1775_vm12 = vcmask 123968  }
 0x290   : > { %1271 = vadd.xlane.f32.xlu0 %v1270_v57  ;;  %vm1908_vm13 = vcmask 195712   ;;  %vm1910_vm14 = vcmask 189568   ;;  %vm2043_vm15 = vcmask 261312   ;;  %vm2045_vm0 = vcmask 255168  }
 0x292   : > { %v3670_v56 = vld [vmem:[#allocation2 + $0x8] sm:$0x3]  ;;  %v3136_v5 = vld [vmem:[%s4067_s30] sm:$0xff]   ;;  %s4069_s9 = scalar_lea.vmem %s4068_s10, %s3529_s27 }
 0x293   : > { %v1274_v58 = vsel %vm1273_vm4, %v3670_v56, 0.0  ;;  %2915 = vmatpush3.bf16.msra.mxu0 %v3136_v5  ;;  %v3137_v7 = vld [vmem:[%s4067_s30 + $0x8] sm:$0xff]   ;;  %v2805_v16 = vld [vmem:[%s4069_s9] ss:$0 sm:$0xff]  ;;  %s4071_s29 = scalar_lea.vmem %s4070_s5, %s3529_s27  ;;  %s4072_s30 = sld [smem:[#allocation31_spill]] }
 0x294   : > { %1275 = vadd.xlane.f32.xlu0 %v1274_v58  ;;  %2916 = vmatprep.subr.bf16.mxu0 %v3305_v6  ;;  %v2806_v20 = vld [vmem:[%s4071_s29] ss:$0 sm:$0xff]  ;;  %s4074_s9 = scalar_lea.vmem %s3978_s11, %s3529_s27  ;;  %s4075_s29 = scalar_lea.vmem %s3980_s13, %s3529_s27 }
 0x295   : > { %v2811_v37 = vld [vmem:[%s4074_s9] ss:$0 sm:$0xff] }
 0x296   : > { %v2815_v46 = vld [vmem:[%s4075_s29] ss:$0 sm:$0xff]  ;;  %s4078_s29 = scalar_lea.vmem %s3982_s15, %s3529_s27 }
 0x297   : > { %2917 = vmatpush3.bf16.msra.mxu0 %v3137_v7 }
 0x298   : > { %2922 = vmatprep.subr.bf16.mxu0 %v3305_v6 }
 0x299   : > { %s4073_s7 = scalar_lea.vmem %s4072_s30, %s3529_s27  ;;  %s4079_s30 = scalar_lea.vmem %s3983_s16, %s3529_s27 }
 0x29a   : > { %v2807_v29 = vld [vmem:[%s4073_s7] ss:$0 sm:$0xff]  ;;  %s4076_s7 = sld [smem:[#allocation23_spill]] }
 0x2a0   : > { %s4077_s10 = smov %s4076_s7 }
 0x31d   : > { %v1272_v59 = vpop.xlane.xlu0 %1271 }
 0x31e   : > { %v1278_v60 = vmul.f32 0.03125, %v1272_v59 }
 0x320   : > { %v1280_v61 = vsub.f32 %v3668_v55, %v1278_v60 }
 0x321   : > { %v1276_v62 = vpop.xlane.xlu0 %1275 }
 0x322   : > { %v1279_v63 = vmul.f32 0.03125, %v1276_v62  ;;  %v1282_v0 = vmul.f32 %v1280_v61, %v1280_v61 }
 0x324   : > { %v1281_v1 = vsub.f32 %v3670_v56, %v1279_v63  ;;  %v1284_v2 = vsel %vm1269_vm3, %v1282_v0, 0.0 }
 0x325   : > { %1285 = vadd.xlane.f32.xlu1 %v1284_v2  ;;  %v1510_v2 = vld [vmem:[%s4076_s7] sm:$0xff] }
 0x326   : > { %v1283_v3 = vmul.f32 %v1281_v1, %v1281_v1 }
 0x328   : > { %v1287_v4 = vsel %vm1273_vm4, %v1283_v3, 0.0 }
 0x329   : > { %1288 = vadd.xlane.f32.xlu1 %v1287_v4  ;;  %v1511_v4 = vld [vmem:[%s4077_s10 + $0x8] sm:$0x3] }
 0x3b2   : > { %v1286_v8 = vpop.xlane.xlu1 %1285 }
 0x3b3   : > { %v1290_v9 = vmul.f32 0.03125, %v1286_v8 }
 0x3b5   : > { %v1292_v10 = vadd.f32 1e-05, %v1290_v9 }
 0x3b6   : > { %v1289_v11 = vpop.xlane.xlu1 %1288 }
 0x3b7   : > { %3154 = vrsqrt.f32 %v1292_v10  ;;  %v1291_v12 = vmul.f32 0.03125, %v1289_v11 }
 0x3b9   : > { %v1293_v13 = vadd.f32 1e-05, %v1291_v12 }
 0x3bb   : > { %3156 = vrsqrt.f32 %v1293_v13 }
 0x3c1   : > { %v3155_v14 = vpop.eup %3154 }
 0x3c2   : > { %v1296_v15 = vmul.f32 %v3155_v14, %v1280_v61 }
 0x3c4   : > { %v1304_v19 = vmul.f32 %v2805_v16, %v1296_v15 }
 0x3c5   : > { %v3157_v17 = vpop.eup %3156 }
 0x3c6   : > { %v1297_v18 = vmul.f32 %v3157_v17, %v1281_v1  ;;  %v1312_v22 = vadd.f32 %v2806_v20, %v1304_v19 }
 0x3c8   : > { %v1305_v21 = vmul.f32 %v2805_v16, %v1297_v18 }
 0x3ca   : > { %v1313_v23 = vadd.f32 %v2806_v20, %v1305_v21 }
 0x3cc   : > { %v1314_v25 = vpack.c.bf16 %v1313_v23, %v1312_v22 }
 0x3ce   : > { %2919 = vmatmul.mubr.msk.bf16.vlgmr.msra.gmra.mrb[0].mxu0 %vm1269_vm3, %v1314_v25 }
 0x3cf   : > { %2923 = vmatpush3.bf16.msra.mxu0 %v3138_v24  ;;  %2926 = vmatprep.mubr.msk.bf16.mxu0 %vm3306_vm5, %v3305_v6 }
 0x3d0   : > { %2924 = vmatprep.subr.bf16.mxu0 %v3305_v6 }
 0x3d3   : > { %2925 = vmatpush3.bf16.msra.mxu0 %v3139_v26 }
 0x3d4   : > { %2930 = vmatprep.subr.bf16.mxu0 %v3305_v6 }
 0x3d6   : > { %2927 = vmatmul.mubr.msk.bf16.vlgmr.msra.gmra.mrb[4].mxu0 %vm1269_vm3, %v1314_v25 }
 0x3d7   : > { %2931 = vmatpush3.bf16.msra.mxu0 %v3140_v27  ;;  %2934 = vmatprep.mubr.msk.bf16.mxu0 %vm3306_vm5, %v3305_v6 }
 0x3d8   : > { %2932 = vmatprep.subr.bf16.mxu0 %v3305_v6 }
 0x3db   : > { %2933 = vmatpush3.bf16.msra.mxu0 %v3141_v28 }
 0x3dc   : > { %2944 = vmatprep.subr.bf16.mxu0 %v3305_v6 }
 0x3de   : > { %2935 = vmatmul.mubr.msk.bf16.vlgmr.msra.gmra.mrb[8].mxu0 %vm1269_vm3, %v1314_v25 }
 0x3df   : > { %2946 = vmatprep.mubr.msk.bf16.mxu0 %vm3306_vm5, %v3305_v6 }
 0x4a1   : > { %v1375_v30 = vpop.f32.mrb[0].mxu0 }
 0x4a2   : > { %v2920_v31 = vpop.f32.mrb[1].mxu0  ;;  %v1376_v33 = vadd.f32 %v2807_v29, %v1375_v30 }
 0x4a3   : > { %v1378_v32 = vpop.f32.mrb[2].mxu0 }
 0x4a4   : > { %v1379_v34 = vadd.f32 %v2807_v29, %v1378_v32  ;;  %v2921_v35 = vpop.f32.mrb[3].mxu0 }
 0x4a6   : > { %v1512_v36 = vpack.c.bf16 %v1379_v34, %v1376_v33 }
 0x4a8   : > { %1640 = vrot.lane.b32.xlu1 %v1512_v36, %s3307_s24 }
 0x4a9   : > { %v1439_v38 = vpop.f32.mrb[4].mxu0 }
 0x4aa   : > { %v2928_v39 = vpop.f32.mrb[5].mxu0  ;;  %v1440_v41 = vadd.f32 %v2811_v37, %v1439_v38 }
 0x4ab   : > { %v1442_v40 = vpop.f32.mrb[6].mxu0 }
 0x4ac   : > { %v1443_v42 = vadd.f32 %v2811_v37, %v1442_v40  ;;  %v2929_v43 = vpop.f32.mrb[7].mxu0 }
 0x4ae   : > { %v1513_v44 = vpack.c.bf16 %v1443_v42, %v1440_v41 }
 0x4b0   : > { %1779 = vrot.lane.b32.xlu1 %v1513_v44, %s3308_s12  ;;  %1643 = vrot.lane.b32.xlu0 %v1513_v44, %s3307_s24  ;;  %v1520_v45 = vsel %vm1515_vm6, %v1513_v44, 0 }
 0x4b1   : > { %v1503_v47 = vpop.f32.mrb[8].mxu0  ;;  %2939 = vmatpush3.bf16.xpose.msra.mxu1 %v1520_v45 }
 0x4b2   : > { %v2936_v48 = vpop.f32.mrb[9].mxu0  ;;  %2950 = vmatprep.subr.bf16.mxu1 %v3305_v6  ;;  %v1504_v50 = vadd.f32 %v2815_v46, %v1503_v47 }
 0x4b3   : > { %v1506_v49 = vpop.f32.mrb[10].mxu0 }
 0x4b4   : > { %v1507_v51 = vadd.f32 %v2815_v46, %v1506_v49  ;;  %1777 = vrot.lane.b32.xlu1 %v1512_v36, %s3308_s12  ;;  %1914 = vrot.lane.b32.xlu0 %v1513_v44, %s3309_s0  ;;  %v2937_v52 = vpop.f32.mrb[11].mxu0 }
 0x4b6   : > { %v3739_v53 = vpack.c.bf16 %v1507_v51, %v1504_v50 }
 0x4b8   : > { %1912 = vrot.lane.b32.xlu1 %v1512_v36, %s3309_s0  ;;  %2941 = vmatmul.mubr.msk.bf16.vlgmr.msra.gmra.mrb[0].mxu1 %vm1515_vm6, %v1512_v36  ;;  %v1593_v54 = vsel %vm1591_vm7, %v3739_v53, 0 }
 0x4b9   : > { %2945 = vmatpush3.bf16.msra.mxu0 %v1593_v54  ;;  %2952 = vmatprep.mubr.msk.bf16.mxu1 %vm3306_vm5, %v3305_v6 }
 0x4ba   : > { %2956 = vmatprep.subr.bf16.mxu0 %v3305_v6 }
 0x51a   : > { %v1641_v59 = vpop.permute.xlu1 %1640 }
 0x522   : > { %v1644_v57 = vpop.permute.xlu0 %1643  ;;  %v1780_v60 = vpop.permute.xlu1 %1779 }
 0x523   : > { %v1649_v58 = vsel %vm1515_vm6, %v1644_v57, 0  ;;  %v1785_v61 = vsel %vm1515_vm6, %v1780_v60, 0 }
 0x524   : > { %2951 = vmatpush3.bf16.xpose.msra.mxu1 %v1649_v58 }
 0x525   : > { %2962 = vmatprep.subr.bf16.mxu1 %v3305_v6 }
 0x526   : > { %v1915_v62 = vpop.permute.xlu0 %1914  ;;  %v1778_v63 = vpop.permute.xlu1 %1777 }
 0x527   : > { %v1920_v0 = vsel %vm1515_vm6, %v1915_v62, 0 }
 0x52a   : > { %v1913_v1 = vpop.permute.xlu1 %1912 }
 0x52b   : > { %2953 = vmatmul.mubr.msk.bf16.vlgmr.msra.gmra.mrb[4].mxu1 %vm1515_vm6, %v1641_v59 }
 0x52c   : > { %2963 = vmatpush3.bf16.xpose.msra.mxu1 %v1785_v61  ;;  %2964 = vmatprep.mubr.msk.bf16.mxu1 %vm3306_vm5, %v3305_v6 }
 0x52d   : > { %2974 = vmatprep.subr.bf16.mxu1 %v3305_v6 }
 0x533   : > { %2965 = vmatmul.mubr.msk.bf16.vlgmr.msra.gmra.mrb[8].mxu1 %vm1515_vm6, %v1778_v63 }
 0x534   : > { %2975 = vmatpush3.bf16.xpose.msra.mxu1 %v1920_v0  ;;  %2976 = vmatprep.mubr.msk.bf16.mxu1 %vm3306_vm5, %v3305_v6 }
 0x535   : > { %2986 = vmatprep.subr.bf16.mxu1 %v3305_v6 }
 0x53b   : > { %2977 = vmatmul.mubr.msk.bf16.vlgmr.msra.gmra.mrb[12].mxu1 %vm1515_vm6, %v1913_v1 }
 0x53c   : > { %2990 = vmatprep.mubr.msk.bf16.mxu1 %vm3306_vm5, %v3305_v6 }
 0x58b   : > { %v1556_v3 = vpop.f32.mrb[0].mxu1 }
 0x58c   : > { %v1557_v5 = vadd.f32 %v1556_v3, %v1510_v2  ;;  %v2942_v7 = vpop.f32.mrb[1].mxu1 }
 0x58d   : > { %v1559_v8 = vpop.f32.mrb[2].mxu1 }
 0x58e   : > { %v1560_v9 = vadd.f32 %v1559_v8, %v1511_v4  ;;  %v2943_v10 = vpop.f32.mrb[3].mxu1  ;;  %v1564_v11 = vsel %vm1563_vm8, %v1557_v5, -inf }
 0x58f   : > { %1565 = vmax.xlane.f32.xlu0 %v1564_v11 }
 0x590   : > { %v1568_v12 = vsel %vm1567_vm9, %v1560_v9, -inf }
 0x591   : > { %1569 = vmax.xlane.f32.xlu1 %v1568_v12 }
 0x5fe   : > { %v1685_v13 = vpop.f32.mrb[4].mxu1 }
 0x5ff   : > { %v1686_v14 = vadd.f32 %v1685_v13, %v1510_v2  ;;  %v2954_v15 = vpop.f32.mrb[5].mxu1 }
 0x600   : > { %v1688_v16 = vpop.f32.mrb[6].mxu1 }
 0x601   : > { %v1689_v17 = vadd.f32 %v1688_v16, %v1511_v4  ;;  %v2955_v18 = vpop.f32.mrb[7].mxu1  ;;  %v1692_v19 = vsel %vm1563_vm8, %v1686_v14, -inf }
 0x602   : > { %1693 = vmax.xlane.f32.xlu0 %v1692_v19 }
 0x603   : > { %v1695_v20 = vsel %vm1567_vm9, %v1689_v17, -inf }
 0x606   : > { %1696 = vmax.xlane.f32.xlu0 %v1695_v20  ;;  %v1821_v21 = vpop.f32.mrb[8].mxu1 }
 0x607   : > { %v1822_v22 = vadd.f32 %v1821_v21, %v1510_v2  ;;  %v2966_v23 = vpop.f32.mrb[9].mxu1 }
 0x608   : > { %v1824_v24 = vpop.f32.mrb[10].mxu1 }
 0x609   : > { %v1825_v25 = vadd.f32 %v1824_v24, %v1511_v4  ;;  %v2967_v26 = vpop.f32.mrb[11].mxu1  ;;  %v1828_v27 = vsel %vm1563_vm8, %v1822_v22, -inf }
 0x60a   : > { %1829 = vmax.xlane.f32.xlu0 %v1828_v27 }
 0x60b   : > { %v1831_v28 = vsel %vm1567_vm9, %v1825_v25, -inf }
 0x60c   : > { %1832 = vmax.xlane.f32.xlu1 %v1831_v28 }
 0x60e   : > { %v1956_v29 = vpop.f32.mrb[12].mxu1 }
 0x60f   : > { %v1957_v30 = vadd.f32 %v1956_v29, %v1510_v2  ;;  %v2978_v31 = vpop.f32.mrb[13].mxu1 }
 0x610   : > { %v1959_v32 = vpop.f32.mrb[14].mxu1 }
 0x611   : > { %v3775_v33 = vadd.f32 %v1959_v32, %v1511_v4  ;;  %v2979_v34 = vpop.f32.mrb[15].mxu1  ;;  %v1963_v35 = vsel %vm1563_vm8, %v1957_v30, -inf }
 0x612   : > { %1964 = vmax.xlane.f32.xlu0 %v1963_v35 }
 0x613   : > { %v1966_v36 = vsel %vm1567_vm9, %v3775_v33, -inf }
 0x614   : > { %1967 = vmax.xlane.f32.xlu1 %v1966_v36 }
 0x61c   : > { %v1566_v37 = vpop.xlane.xlu0 %1565 }
 0x61d   : > { %v1571_v38 = vsub.f32 %v1557_v5, %v1566_v37 }
 0x61e   : > { %v1570_v39 = vpop.xlane.xlu1 %1569 }
 0x61f   : > { %v1573_v40 = vmul.f32 1.442695, %v1571_v38  ;;  %v1572_v41 = vsub.f32 %v1560_v9, %v1570_v39 }
 0x621   : > { %3158 = vpow2.f32 %v1573_v40  ;;  %v1575_v42 = vmul.f32 1.442695, %v1572_v41 }
 0x623   : > { %3160 = vpow2.f32 %v1575_v42 }
 0x62b   : > { %v3159_v43 = vpop.eup %3158 }
 0x62c   : > { %v1577_v44 = vsel %vm1563_vm8, %v3159_v43, 0.0 }
 0x62d   : > { %v3161_v45 = vpop.eup %3160  ;;  %1578 = vadd.xlane.f32.xlu0 %v1577_v44 }
 0x62e   : > { %v1580_v46 = vsel %vm1567_vm9, %v3161_v45, 0.0 }
 0x62f   : > { %1581 = vadd.xlane.f32.xlu1 %v1580_v46 }
 0x68f   : > { %v1694_v47 = vpop.xlane.xlu0 %1693 }
 0x690   : > { %v1698_v48 = vsub.f32 %v1686_v14, %v1694_v47 }
 0x692   : > { %v1700_v49 = vmul.f32 1.442695, %v1698_v48 }
 0x693   : > { %v1697_v50 = vpop.xlane.xlu0 %1696 }
 0x694   : > { %3162 = vpow2.f32 %v1700_v49  ;;  %v1699_v51 = vsub.f32 %v1689_v17, %v1697_v50 }
 0x696   : > { %v1702_v52 = vmul.f32 1.442695, %v1699_v51 }
 0x697   : > { %v1830_v54 = vpop.xlane.xlu0 %1829 }
 0x698   : > { %3164 = vpow2.f32 %v1702_v52  ;;  %v1834_v57 = vsub.f32 %v1822_v22, %v1830_v54 }
 0x699   : > { %v1833_v58 = vpop.xlane.xlu1 %1832 }
 0x69a   : > { %v1836_v59 = vmul.f32 1.442695, %v1834_v57  ;;  %v1835_v60 = vsub.f32 %v1825_v25, %v1833_v58 }
 0x69c   : > { %3166 = vpow2.f32 %v1836_v59  ;;  %v1838_v61 = vmul.f32 1.442695, %v1835_v60 }
 0x69e   : > { %v3163_v62 = vpop.eup %3162  ;;  %3168 = vpow2.f32 %v1838_v61 }
 0x69f   : > { %v1965_v63 = vpop.xlane.xlu0 %1964  ;;  %v1704_v0 = vsel %vm1563_vm8, %v3163_v62, 0.0 }
 0x6a0   : > { %v1969_v1 = vsub.f32 %v1957_v30, %v1965_v63  ;;  %1705 = vadd.xlane.f32.xlu0 %v1704_v0 }
 0x6a1   : > { %v1968_v12 = vpop.xlane.xlu1 %1967 }
 0x6a2   : > { %v3165_v2 = vpop.eup %3164  ;;  %v1971_v3 = vmul.f32 1.442695, %v1969_v1  ;;  %v1970_v19 = vsub.f32 %v3775_v33, %v1968_v12  ;;  %v3142_v1 = vld [vmem:[%s3575_s1] sm:$0xff]  }
 0x6a3   : > { %v1707_v4 = vsel %vm1567_vm9, %v3165_v2, 0.0  ;;  %2987 = vmatpush3.bf16.msra.mxu1 %v3142_v1  ;;  %v2833_v1 = vld [vmem:[%s1053_s28] ss:$0 sm:$0xff] }
 0x6a4   : > { %3170 = vpow2.f32 %v1971_v3  ;;  %1708 = vadd.xlane.f32.xlu1 %v1707_v4  ;;  %v1973_v21 = vmul.f32 1.442695, %v1970_v19  ;;  %2988 = vmatprep.subr.bf16.mxu1 %v3305_v6 }
 0x6a6   : > { %v3167_v5 = vpop.eup %3166 }
 0x6a7   : > { %v1840_v7 = vsel %vm1563_vm8, %v3167_v5, 0.0 }
 0x6a8   : > { %v3169_v8 = vpop.eup %3168  ;;  %1841 = vadd.xlane.f32.xlu0 %v1840_v7 }
 0x6a9   : > { %v1843_v9 = vsel %vm1567_vm9, %v3169_v8, 0.0 }
 0x6aa   : > { %1844 = vadd.xlane.f32.xlu1 %v1843_v9 }
 0x6ae   : > { %v3786_v10 = vpop.eup %3170 }
 0x6af   : > { %v1975_v11 = vsel %vm1563_vm8, %v3786_v10, 0.0 }
 0x6b0   : > { %1976 = vadd.xlane.f32.xlu0 %v1975_v11 }
 0x6ba   : > { %v1579_v13 = vpop.xlane.xlu0 %1578 }
 0x6bb   : > { %3172 = vrcp.f32 %v1579_v13  ;;  %1851 = vrot.lane.b32.xlu1 %v3739_v53, %s3308_s12  ;;  %s3311_s12 = smov 16  }
 0x6bc   : > { %v1582_v14 = vpop.xlane.xlu1 %1581 }
 0x6bd   : > { %3174 = vrcp.f32 %v1582_v14 }
 0x6be   : > { %3176 = vpow2.f32 %v1973_v21 }
 0x6c5   : > { %v3173_v15 = vpop.eup %3172 }
 0x6c6   : > { %1716 = vrot.lane.b32.xlu0 %v3739_v53, %s3307_s24  ;;  %v1585_v17 = vmul.f32 %v3173_v15, %v3159_v43  ;;  %s3310_s24 = smov 8  }
 0x6c7   : > { %v3175_v16 = vpop.eup %3174 }
 0x6c8   : > { %v1586_v18 = vmul.f32 %v3175_v16, %v3161_v45  ;;  %v3177_v22 = vpop.eup %3176 }
 0x6c9   : > { %v1978_v23 = vsel %vm1567_vm9, %v3177_v22, 0.0 }
 0x6ca   : > { %v1587_v20 = vpack.c.bf16 %v1586_v18, %v1585_v17  ;;  %v2827_v17 = vld [vmem:[%s4078_s29] ss:$0 sm:$0xff] }
 0x6cc   : > { %2947 = vmatmul.mubr.msk.bf16.vlgmr.msra.gmra.mrb[12].mxu0 %vm1563_vm8, %v1587_v20 }
 0x6cd   : > { %2958 = vmatprep.mubr.msk.bf16.mxu0 %vm3306_vm5, %v3305_v6 }
 0x6df   : > { %1979 = vadd.xlane.f32.xlu1 %v1978_v23 }
 0x6f0   : > { %1986 = vrot.lane.b32.xlu1 %v3739_v53, %s3309_s0 }
 0x72d   : > { %v1706_v25 = vpop.xlane.xlu0 %1705 }
 0x731   : > { %v1709_v24 = vpop.xlane.xlu1 %1708 }
 0x732   : > { %3178 = vrcp.f32 %v1709_v24 }
 0x733   : > { %3180 = vrcp.f32 %v1706_v25 }
 0x735   : > { %v1842_v27 = vpop.xlane.xlu0 %1841 }
 0x737   : > { %v1845_v26 = vpop.xlane.xlu1 %1844 }
 0x738   : > { %3182 = vrcp.f32 %v1845_v26 }
 0x739   : > { %3184 = vrcp.f32 %v1842_v27 }
 0x73b   : > { %v1852_v35 = vpop.permute.xlu1 %1851 }
 0x73c   : > { %v3179_v28 = vpop.eup %3178  ;;  %v1857_v37 = vsel %vm1591_vm7, %v1852_v35, 0 }
 0x73d   : > { %v1977_v29 = vpop.xlane.xlu0 %1976  ;;  %v3181_v30 = vpop.eup %3180  ;;  %v1713_v31 = vmul.f32 %v3179_v28, %v3165_v2  ;;  %v3143_v2 = vld [vmem:[%s3575_s1 + $0x8] sm:$0xff]  }
 0x73e   : > { %v1712_v33 = vmul.f32 %v3181_v30, %v3163_v62  ;;  %3186 = vrcp.f32 %v1977_v29  ;;  %2989 = vmatpush3.bf16.msra.mxu1 %v3143_v2 }
 0x73f   : > { %3002 = vmatprep.subr.bf16.mxu1 %v3305_v6 }
 0x740   : > { %v1714_v36 = vpack.c.bf16 %v1713_v31, %v1712_v33 }
 0x741   : > { %v1717_v32 = vpop.permute.xlu0 %1716 }
 0x742   : > { %v1722_v34 = vsel %vm1591_vm7, %v1717_v32, 0  ;;  %v3183_v53 = vpop.eup %3182 }
 0x743   : > { %2957 = vmatpush3.bf16.msra.mxu0 %v1722_v34  ;;  %v3185_v38 = vpop.eup %3184  ;;  %v1849_v39 = vmul.f32 %v3183_v53, %v3169_v8  ;;  %v3145_v53 = vld [vmem:[%s3592_s6 + $0x8] sm:$0xff]  }
 0x744   : > { %2968 = vmatprep.subr.bf16.mxu0 %v3305_v6  ;;  %v1848_v40 = vmul.f32 %v3185_v38, %v3167_v5 }
 0x746   : > { %2959 = vmatmul.mubr.msk.bf16.vlgmr.msra.gmra.mrb[16].mxu0 %vm1563_vm8, %v1714_v36  ;;  %v1850_v41 = vpack.c.bf16 %v1849_v39, %v1848_v40  ;;  %v3144_v36 = vld [vmem:[%s3592_s6] sm:$0xff]  }
 0x747   : > { %2969 = vmatpush3.bf16.msra.mxu0 %v1857_v37  ;;  %2970 = vmatprep.mubr.msk.bf16.mxu0 %vm3306_vm5, %v3305_v6 }
 0x748   : > { %2980 = vmatprep.subr.bf16.mxu0 %v3305_v6  ;;  %v3187_v45 = vpop.eup %3186 }
 0x749   : > { %v1983_v47 = vmul.f32 %v3187_v45, %v3786_v10  ;;  %v2831_v45 = vld [vmem:[%s4079_s30] ss:$0 sm:$0xff] }
 0x74e   : > { %2971 = vmatmul.mubr.msk.bf16.vlgmr.msra.gmra.mrb[20].mxu0 %vm1563_vm8, %v1850_v41 }
 0x74f   : > { %2982 = vmatprep.mubr.msk.bf16.mxu0 %vm3306_vm5, %v3305_v6 }
 0x76c   : > { %v1980_v42 = vpop.xlane.xlu1 %1979 }
 0x76d   : > { %3188 = vrcp.f32 %v1980_v42 }
 0x770   : > { %v1987_v43 = vpop.permute.xlu1 %1986 }
 0x771   : > { %v1992_v44 = vsel %vm1591_vm7, %v1987_v43, 0 }
 0x772   : > { %2981 = vmatpush3.bf16.msra.mxu0 %v1992_v44 }
 0x773   : > { %2994 = vmatprep.subr.bf16.mxu0 %v3305_v6 }
 0x777   : > { %v3189_v46 = vpop.eup %3188 }
 0x778   : > { %v1984_v48 = vmul.f32 %v3189_v46, %v3177_v22 }
 0x77a   : > { %v1985_v49 = vpack.c.bf16 %v1984_v48, %v1983_v47 }
 0x77c   : > { %2983 = vmatmul.mubr.msk.bf16.vlgmr.msra.gmra.mrb[24].mxu0 %vm1563_vm8, %v1985_v49  ;;  %v2832_v49 = vld [vmem:[%s4080_s3] ss:$0 sm:$0xff] }
 0x77d   : > { %2998 = vmatprep.mubr.msk.bf16.mxu0 %vm3306_vm5, %v3305_v6  ;;  %2995 = vmatpush3.bf16.msra.mxu0 %v3144_v36 }
 0x77e   : > { %2996 = vmatprep.subr.bf16.mxu0 %v3305_v6 }
 0x781   : > { %2997 = vmatpush3.bf16.msra.mxu0 %v3145_v53 }
 0x79f   : > { %v1629_v50 = vpop.f32.mrb[12].mxu0 }
 0x7a0   : > { %1636 = vst.msk [vmem:[#allocation3] sm:$0xff] %vm1515_vm6, %v1629_v50  ;;  %v2948_v51 = vpop.f32.mrb[13].mxu0 }
 0x7a1   : > { %v1632_v52 = vpop.f32.mrb[14].mxu0 }
 0x7a2   : > { %1638 = vst.msk [vmem:[#allocation3 + $0x8] sm:$0x3] %vm1637_vm10, %v1632_v52  ;;  %v2949_v54 = vpop.f32.mrb[15].mxu0 }
 0x819   : > { %v1758_v57 = vpop.f32.mrb[16].mxu0 }
 0x81a   : > { %1767 = vrot.lane.b32.xlu1 %v1758_v57, %s3310_s24  ;;  %v2960_v58 = vpop.f32.mrb[17].mxu0  ;;  %v3146_v57 = vld [vmem:[%s3606_s8] sm:$0xff]  }
 0x81b   : > { %v1761_v59 = vpop.f32.mrb[18].mxu0  ;;  %v3147_v58 = vld [vmem:[%s3606_s8 + $0x8] sm:$0xff]  }
 0x81c   : > { %1769 = vrot.lane.b32.xlu0 %v1761_v59, %s3310_s24  ;;  %v2961_v60 = vpop.f32.mrb[19].mxu0  ;;  %v3148_v59 = vld [vmem:[%s3606_s8 + $0x10] sm:$0xff]  }
 0x81d   : > { %v3149_v60 = vld [vmem:[%s3606_s8 + $0x18] sm:$0xff]  }
 0x821   : > { %v1893_v61 = vpop.f32.mrb[20].mxu0 }
 0x822   : > { %1902 = vrot.lane.b32.xlu1 %v1893_v61, %s3311_s12  ;;  %v2972_v62 = vpop.f32.mrb[21].mxu0  ;;  %v3150_v61 = vld [vmem:[%s3606_s8 + $0x20] sm:$0xff]  }
 0x823   : > { %v1896_v63 = vpop.f32.mrb[22].mxu0  ;;  %v3151_v62 = vld [vmem:[%s3606_s8 + $0x28] sm:$0xff]  }
 0x824   : > { %1904 = vrot.lane.b32.xlu0 %v1896_v63, %s3311_s12  ;;  %v2973_v0 = vpop.f32.mrb[23].mxu0  ;;  %v3152_v63 = vld [vmem:[%s3606_s8 + $0x30] sm:$0xff]   ;;  %s4081_s12 = sld [smem:[#allocation10_spill]] }
 0x825   : > { %v3153_v0 = vld [vmem:[%s3606_s8 + $0x38] sm:$0xff]  }
 0x82a   : > { %p2848_p1 = scmp.ne.s32.totalorder %s4081_s12, 1 }
 0x82b   : > { %vm2368_vm1 = vcmask (!%p2848_p1), 253952   ;;  %vm2370_vm2 = vcmask (!%p2848_p1), 259077   ;;  %v3313_v36 = vmov (!%p2848_p1), 0.0   ;;  %s4083_s14 = sld [smem:[#allocation38_spill]] (!%p2848_p1)  ;;  %s4084_s7 = sld [smem:[#allocation35_spill]] (!%p2848_p1) }
 0x82c   : > { %3022 = vmatprep.subr.bf16.mxu0 (!%p2848_p1), %v3313_v36  ;;  %s4085_s24 = sld [smem:[#allocation36_spill]] (!%p2848_p1) }
 0x84f   : > { %v2028_v3 = vpop.f32.mrb[24].mxu0 }
 0x850   : > { %2037 = vrot.lane.b32.xlu1 %v2028_v3, %s3312_s22  ;;  %v2984_v4 = vpop.f32.mrb[25].mxu0 }
 0x851   : > { %v2031_v5 = vpop.f32.mrb[26].mxu0 }
 0x852   : > { %2039 = vrot.lane.b32.xlu0 %v2031_v5, %s3312_s22  ;;  %v2985_v7 = vpop.f32.mrb[27].mxu0  ;;  %s4082_s22 = sld [smem:[#allocation37_spill]] (!%p2848_p1) }
 0x858   : > { %v3203_v53 = vld [vmem:[%s4082_s22 + $0x8] sm:$0xff] (!%p2848_p1)  }
 0x88c   : > { %v1768_v8 = vpop.permute.xlu1 %1767 }
 0x88d   : > { %1774 = vst.msk [vmem:[#allocation3] sm:$0xff] %vm1773_vm11, %v1768_v8 }
 0x88e   : > { %v1770_v9 = vpop.permute.xlu0 %1769 }
 0x88f   : > { %1776 = vst.msk [vmem:[#allocation3 + $0x8] sm:$0x3] %vm1775_vm12, %v1770_v9 }
 0x894   : > { %v1903_v10 = vpop.permute.xlu1 %1902 }
 0x895   : > { %1909 = vst.msk [vmem:[#allocation3] sm:$0xff] %vm1908_vm13, %v1903_v10 }
 0x896   : > { %v1905_v11 = vpop.permute.xlu0 %1904 }
 0x897   : > { %1911 = vst.msk [vmem:[#allocation3 + $0x8] sm:$0x3] %vm1910_vm14, %v1905_v11 }
 0x8c2   : > { %v2038_v12 = vpop.permute.xlu1 %2037 }
 0x8c3   : > { %2044 = vst.msk [vmem:[#allocation3] sm:$0xff] %vm2043_vm15, %v2038_v12 }
 0x8c4   : > { %v2040_v13 = vpop.permute.xlu0 %2039 }
 0x8c5   : > { %2046 = vst.msk [vmem:[#allocation3 + $0x8] sm:$0x3] %vm2045_vm0, %v2040_v13 }
 0x8ca   : > { %v2047_v14 = vld [vmem:[#allocation3] sm:$0xff] }
 0x8cc   : > { %v2048_v15 = vld [vmem:[#allocation3 + $0x8] sm:$0x3] }
 0x8cd   : > { %v2049_v16 = vpack.c.bf16 %v2048_v15, %v2047_v14 }
 0x8cf   : > { %2991 = vmatmul.mubr.msk.bf16.vlgmr.msra.gmra.mrb[16].mxu1 %vm1269_vm3, %v2049_v16 }
 0x8d0   : > { %3018 = vmatprep.mubr.msk.bf16.mxu1 %vm3306_vm5, %v3305_v6  ;;  %3003 = vmatpush3.bf16.msra.mxu1 %v3146_v57  ;;  %vm3314_vm5 = vmmov (!%p2848_p1), 0  }
 0x8d1   : > { %3004 = vmatprep.subr.bf16.mxu1 %v3305_v6 }
 0x8d4   : > { %3005 = vmatpush3.bf16.msra.mxu1 %v3147_v58 }
 0x8d5   : > { %3006 = vmatprep.subr.bf16.mxu1 %v3305_v6 }
 0x8d8   : > { %3007 = vmatpush3.bf16.msra.mxu1 %v3148_v59 }
 0x8d9   : > { %3008 = vmatprep.subr.bf16.mxu1 %v3305_v6 }
 0x8dc   : > { %3009 = vmatpush3.bf16.msra.mxu1 %v3149_v60 }
 0x8dd   : > { %3010 = vmatprep.subr.bf16.mxu1 %v3305_v6 }
 0x8e0   : > { %3011 = vmatpush3.bf16.msra.mxu1 %v3150_v61 }
 0x8e1   : > { %3012 = vmatprep.subr.bf16.mxu1 %v3305_v6 }
 0x8e4   : > { %3013 = vmatpush3.bf16.msra.mxu1 %v3151_v62 }
 0x8e5   : > { %3014 = vmatprep.subr.bf16.mxu1 %v3305_v6 }
 0x8e8   : > { %3015 = vmatpush3.bf16.msra.mxu1 %v3152_v63 }
 0x8e9   : > { %3016 = vmatprep.subr.bf16.mxu1 %v3305_v6 }
 0x8ec   : > { %3017 = vmatpush3.bf16.msra.mxu1 %v3153_v0 }
 0x8ed   : > { %3030 = vmatprep.subr.bf16.mxu1 (!%p2848_p1), %v3313_v36 }
 0x9a2   : > { %v2110_v18 = vpop.f32.mrb[16].mxu1 }
 0x9a3   : > { %v2111_v19 = vadd.f32 %v2827_v17, %v2110_v18  ;;  %v2992_v20 = vpop.f32.mrb[17].mxu1 }
 0x9a4   : > { %v2113_v21 = vpop.f32.mrb[18].mxu1 }
 0x9a5   : > { %v3831_v22 = vadd.f32 %v2111_v19, %v3668_v55  ;;  %v2114_v23 = vadd.f32 %v2827_v17, %v2113_v21  ;;  %v2993_v24 = vpop.f32.mrb[19].mxu1  ;;  %v2839_v21 = vld [vmem:[%s1061_s2] ss:$0 sm:$0xff] }
 0x9a7   : > { %v3834_v25 = vadd.f32 %v2114_v23, %v3670_v56  ;;  %v2121_v26 = vsel %vm1269_vm3, %v3831_v22, 0.0 }
 0x9a8   : > { %2122 = vadd.xlane.f32.xlu1 %v2121_v26 }
 0x9a9   : > { %v2124_v27 = vsel %vm1273_vm4, %v3834_v25, 0.0 }
 0x9aa   : > { %2125 = vadd.xlane.f32.xlu0 %v2124_v27 }
 0xa35   : > { %v2123_v28 = vpop.xlane.xlu1 %2122 }
 0xa36   : > { %v2127_v29 = vmul.f32 0.03125, %v2123_v28 }
 0xa37   : > { %v2126_v30 = vpop.xlane.xlu0 %2125 }
 0xa38   : > { %v2129_v55 = vsub.f32 %v3831_v22, %v2127_v29  ;;  %v2128_v31 = vmul.f32 0.03125, %v2126_v30 }
 0xa3a   : > { %v2130_v32 = vsub.f32 %v3834_v25, %v2128_v31  ;;  %v2131_v56 = vmul.f32 %v2129_v55, %v2129_v55 }
 0xa3c   : > { %v2133_v33 = vsel %vm1269_vm3, %v2131_v56, 0.0  ;;  %v2132_v34 = vmul.f32 %v2130_v32, %v2130_v32 }
 0xa3d   : > { %2134 = vadd.xlane.f32.xlu0 %v2133_v33 }
 0xa3e   : > { %v2136_v35 = vsel %vm1273_vm4, %v2132_v34, 0.0 }
 0xa41   : > { %2137 = vadd.xlane.f32.xlu0 %v2136_v35 }
 0xaca   : > { %v2135_v37 = vpop.xlane.xlu0 %2134 }
 0xacb   : > { %v2139_v38 = vmul.f32 0.03125, %v2135_v37  ;;  %v3204_v37 = vld [vmem:[%s4083_s14] sm:$0xff] (!%p2848_p1)  }
 0xacd   : > { %v2141_v39 = vadd.f32 1e-05, %v2139_v38 }
 0xace   : > { %v2138_v40 = vpop.xlane.xlu0 %2137 }
 0xacf   : > { %3190 = vrsqrt.f32 %v2141_v39  ;;  %v2140_v41 = vmul.f32 0.03125, %v2138_v40 }
 0xad1   : > { %v2142_v42 = vadd.f32 1e-05, %v2140_v41 }
 0xad3   : > { %3192 = vrsqrt.f32 %v2142_v42  ;;  %v2849_v42 = vld [vmem:[%s4084_s7] ss:$0 sm:$0xff] (!%p2848_p1) }
 0xad9   : > { %v3191_v43 = vpop.eup %3190 }
 0xada   : > { %v2145_v44 = vmul.f32 %v3191_v43, %v2129_v55 }
 0xadc   : > { %v2153_v47 = vmul.f32 %v2831_v45, %v2145_v44  ;;  %v2850_v44 = vld [vmem:[%s4085_s24] ss:$0 sm:$0xff] (!%p2848_p1) }
 0xadd   : > { %v3193_v46 = vpop.eup %3192 }
 0xade   : > { %v2146_v48 = vmul.f32 %v3193_v46, %v2130_v32  ;;  %v2161_v51 = vadd.f32 %v2832_v49, %v2153_v47 }
 0xae0   : > { %v2154_v50 = vmul.f32 %v2831_v45, %v2146_v48  ;;  %v3205_v48 = vld [vmem:[%s4083_s14 + $0x8] sm:$0xff] (!%p2848_p1)  }
 0xae2   : > { %v2162_v52 = vadd.f32 %v2832_v49, %v2154_v50 }
 0xae4   : > { %v2163_v54 = vpack.c.bf16 %v2162_v52, %v2161_v51 }
 0xae6   : > { %2999 = vmatmul.mubr.msk.bf16.vlgmr.msra.gmra.mrb[28].mxu0 %vm1269_vm3, %v2163_v54 }
 0xae7   : > { %3026 = vmatprep.mubr.msk.bf16.mxu0 (!%p2848_p1), %vm3314_vm5, %v3313_v36 }
 0xbb9   : > { %v2224_v2 = vpop.f32.mrb[28].mxu0 }
 0xbba   : > { %v2225_v3 = vadd.f32 %v2833_v1, %v2224_v2  ;;  %v3000_v4 = vpop.f32.mrb[29].mxu0 }
 0xbbb   : > { %v2227_v5 = vpop.f32.mrb[30].mxu0 }
 0xbbc   : > { %v2837_v7 = vmul.f32 -1.702, %v2225_v3  ;;  %v2228_v8 = vadd.f32 %v2833_v1, %v2227_v5  ;;  %v3001_v9 = vpop.f32.mrb[31].mxu0 }
 0xbbe   : > { %v2235_v10 = vmul.f32 1.442695, %v2837_v7  ;;  %v2838_v11 = vmul.f32 -1.702, %v2228_v8 }
 0xbc0   : > { %3194 = vpow2.f32 %v2235_v10  ;;  %v2237_v12 = vmul.f32 1.442695, %v2838_v11 }
 0xbc2   : > { %3196 = vpow2.f32 %v2237_v12 }
 0xbca   : > { %v3195_v6 = vpop.eup %3194 }
 0xbcb   : > { %v2239_v13 = vadd.f32 1.0, %v3195_v6 }
 0xbcc   : > { %v3197_v14 = vpop.eup %3196 }
 0xbcd   : > { %3198 = vrcp.f32 %v2239_v13  ;;  %v2240_v15 = vadd.f32 1.0, %v3197_v14 }
 0xbcf   : > { %3200 = vrcp.f32 %v2240_v15 }
 0xbd7   : > { %v3199_v16 = vpop.eup %3198 }
 0xbd8   : > { %v2245_v18 = vmul.f32 %v3199_v16, %v2225_v3 }
 0xbd9   : > { %v3201_v17 = vpop.eup %3200 }
 0xbda   : > { %v2246_v19 = vmul.f32 %v3201_v17, %v2228_v8 }
 0xbdc   : > { %v2247_v20 = vpack.c.bf16 %v2246_v19, %v2245_v18 }
 0xbde   : > { %3019 = vmatmul.mubr.bf16.vlgmr.msra.gmra.mrb[20].mxu1 %v2247_v20 }
 0xbdf   : > { %3034 = vmatprep.mubr.msk.bf16.mxu1 (!%p2848_p1), %vm3314_vm5, %v3313_v36  ;;  %3031 = vmatpush3.bf16.msra.mxu1 (!%p2848_p1), %v3204_v37 }
 0xbe0   : > { %3032 = vmatprep.subr.bf16.mxu1 (!%p2848_p1), %v3313_v36 }
 0xbe3   : > { %3033 = vmatpush3.bf16.msra.mxu1 (!%p2848_p1), %v3205_v48 }
 0xcb1   : > { %v2353_v23 = vpop.f32.mrb[20].mxu1 }
 0xcb2   : > { %v2354_v24 = vadd.f32 %v2839_v21, %v2353_v23  ;;  %v3020_v26 = vpop.f32.mrb[21].mxu1  ;;  %2367 = sbr.rel (%p2848_p1) target bundleno = 4009 (0xfa9), region = 132 }
 0xcb3   : > { %v2356_v27 = vpop.f32.mrb[22].mxu1 }
 0xcb4   : > { %v2360_v28 = vadd.f32 %v2354_v24, %v3831_v22  ;;  %v2357_v29 = vadd.f32 %v2839_v21, %v2356_v27  ;;  %v3021_v30 = vpop.f32.mrb[23].mxu1 }
 0xcb6   : > { %2362 = vst.msk [vmem:[#allocation2] sm:$0xff] %vm1269_vm3, %v2360_v28  ;;  %v2361_v55 = vadd.f32 %v2357_v29, %v3834_v25  ;;  %v3202_v25 = vld [vmem:[%s4082_s22] sm:$0xff] (!%p2848_p1)  }
 0xcb7   : > { %2369 = vst.msk [vmem:[#allocation3] sm:$0x1] (!%p2848_p1), %vm2368_vm1, %v2360_v28  ;;  %3023 = vmatpush3.bf16.msra.mxu0 (!%p2848_p1), %v3202_v25 }
 0xcb8   : > { %2363 = vst.msk [vmem:[#allocation2 + $0x8] sm:$0x3] %vm1273_vm4, %v2361_v55  ;;  %3024 = vmatprep.subr.bf16.mxu0 (!%p2848_p1), %v3313_v36 }
 0xcb9   : > { %2371 = vst.msk [vmem:[#allocation3 - $0x4] sm:$0x20] %vm2370_vm2, %v2360_v28 }
 0xcbb   : > { %3025 = vmatpush3.bf16.msra.mxu0 %v3203_v53 }
 0xcc0   : > { %v2372_v31 = vld [vmem:[#allocation3] sm:$0x3] }
 0xcc1   : > { %v2375_v32 = vsel %vm1273_vm4, %v2372_v31, 0.0 }
 0xcc2   : > { %2376 = vadd.xlane.f32.xlu0 %v2375_v32 }
 0xd4f   : > { %v2377_v22 = vpop.xlane.xlu0 %2376 }
 0xd50   : > { %v2378_v56 = vmul.f32 0.03125, %v2377_v22 }
 0xd52   : > { %v2379_v33 = vsub.f32 %v2372_v31, %v2378_v56 }
 0xd54   : > { %v2380_v34 = vmul.f32 %v2379_v33, %v2379_v33 }
 0xd56   : > { %v2381_v35 = vsel %vm1273_vm4, %v2380_v34, 0.0 }
 0xd57   : > { %2382 = vadd.xlane.f32.xlu0 %v2381_v35 }
 0xde4   : > { %v2383_v38 = vpop.xlane.xlu0 %2382 }
 0xde5   : > { %v2384_v39 = vmul.f32 0.03125, %v2383_v38 }
 0xde7   : > { %v2385_v40 = vadd.f32 1e-05, %v2384_v39 }
 0xde9   : > { %3206 = vrsqrt.f32 %v2385_v40 }
 0xdf3   : > { %v3207_v41 = vpop.eup %3206 }
 0xdf4   : > { %v2387_v43 = vmul.f32 %v3207_v41, %v2379_v33 }
 0xdf6   : > { %v2394_v45 = vmul.f32 %v2849_v42, %v2387_v43 }
 0xdf8   : > { %v2401_v46 = vadd.f32 %v2850_v44, %v2394_v45 }
 0xdfa   : > { %v2402_v47 = vpack.c.bf16 %v2401_v46, %v2401_v46 }
 0xdfc   : > { %3027 = vmatmul.mubr.msk.bf16.vlgmr.msra.gmra.mrb[0].mxu0 %vm1269_vm3, %v2402_v47 }
 0xecf   : > { %v2456_v49 = vpop.f32.mrb[0].mxu0 }
 0xed0   : > { %v2462_v50 = vpack.c.bf16 %v2456_v49, %v2456_v49  ;;  %v3028_v51 = vpop.f32.mrb[1].mxu0 }
 0xed1   : > { %v2459_v52 = vpop.f32.mrb[2].mxu0 }
 0xed2   : > { %v3029_v54 = vpop.f32.mrb[3].mxu0  ;;  %3035 = vmatmul.mubr.msk.bf16.vlgmr.msra.gmra.mrb[0].mxu1 %vm1269_vm3, %v2462_v50 }
 0xfa5   : > { %v2516_v57 = vpop.f32.mrb[0].mxu1 }
 0xfa6   : > { %2522 = vst [vmem:[%s996_s23] sm:$0x3] %v2516_v57  ;;  %v3036_v58 = vpop.f32.mrb[1].mxu1 }
 0xfa7   : > { %v2519_v59 = vpop.f32.mrb[2].mxu1 }
 0xfa8   : > { %v3037_v60 = vpop.f32.mrb[3].mxu1 }
 0xfa9 PF: > { %s4086_s12 = sld [smem:[#allocation11_spill]]  ;;  %s4087_s27 = sld [smem:[#allocation8_spill]] }
 0xfaa   : > { %s4089_s0 = sld [smem:[#allocation39_spill]]  ;;  %s2537_s7 = sshll.u32 %s996_s23, 4  ;;  %s2538_s7 = int_to_ptr.vmem [resolvable:$true] %s2537_s7 }
 0xfab   : > { %s3208_s24 = scalar_lea.vmem %s2538_s7, 32  ;;  %s3315_s28 = smov [#allocation4]  }
 0xfac   : > { %p3209_p2 = scmp.ne.s32.totalorder %s2538_s7, %s3208_s24  ;;  %s3212_s8 = sshll.u32 %s3315_s28, 4  ;;  %s3213_s8 = int_to_ptr.vmem [resolvable:$false] %s3212_s8 }
 0xfad   : > { %s3214_s10 = scalar_lea.vmem %s3213_s8, 64  ;;  %p3215_p6 = scmp.lt.s32.totalorder %s2538_s7, %s3213_s8 }
 0xfae   : > { %p3210_p4 = pnand %p3209_p2, %p3500_p3  ;;  %p3216_p7 = scmp.lt.s32.totalorder %s3214_s10, %s3208_s24 }
 0xfaf   : > { %s2858_s1 = sshll.u32 %s4086_s12, 5  ;;  %s4091_s3 = sand.u32 1, %s4087_s27  }
 0xfb0   : > { %s4090_s30 = smov %s4089_s0  ;;  %s3916_s6 = scalar_lea.hbm %s4089_s0, %s2858_s1 }
 0xfb1   : > { %s2524_s9 = scalar_lea.sflag [#allocation5], %s4091_s3  ;;  %p3211_p5 = pneg %p3210_p4 }
 0xfb2   : > { %p3217_p8 = por %p3216_p7, %p3215_p6 }
 0xfb4   : > { %p3218_p10 = pnand %p3217_p8, %p3211_p5 }
 0xfb6   : > { %3221 = shalt.err (!%p3218_p10)
}
 0xfb7   : > { %s3222_s4 = scalar_lea.hbm %s3916_s6, 32  ;;  %s3226_s27 = scalar_lea.hbm %s4090_s30, 64 }
 0xfb8   : > { %p3223_p11 = scmp.ne.s32.totalorder %s3916_s6, %s3222_s4  ;;  %p3227_p0 = scmp.lt.u32.totalorder %s3916_s6, %s4090_s30 }
 0xfb9   : > { %p3228_p1 = scmp.lt.u32.totalorder %s3226_s27, %s3222_s4  ;;  %p3230_p4 = scmp.lt.u32.totalorder %s3222_s4, %s3916_s6 }
 0xfba   : > { %p3224_p12 = pnand %p3223_p11, %p3500_p3 }
 0xfbb   : > { %p3229_p2 = por %p3228_p1, %p3227_p0 }
 0xfbc   : > { %p3225_p13 = pneg %p3224_p12 }
 0xfbd   : > { %p3231_p5 = por %p3230_p4, %p3229_p2 }
 0xfbf   : > { %p3232_p6 = pnand %p3231_p5, %p3225_p13 }
 0xfc1   : > { %3235 = shalt.err (!%p3232_p6)
}
 0xfc2   : > { %3038 = dma.vmem_to_hbm [thread:$0]  (%p3500_p3), %s2538_s7, 32, %s3916_s6, %s2524_s9  }
 0xfc3 PF: > { %s4092_s10 = sld [smem:[#allocation14_spill]]  ;;  %s4093_s29 = sld [smem:[#allocation7_spill]] }
 0xfc9   : > { %p3044_p7 = scmp.ge.s32.totalorder %s4092_s10, 2  ;;  %s2549_s3 = sand.u32 1, %s4093_s29  }
 0xfca   : > { %s2550_s24 = scalar_lea.sflag [#allocation5], %s2549_s3 }
 0xfcb   : > { %p3041_p8 = pnand %p3044_p7, %p3510_p9 }
 0xfcd   : > { %3269 = dma.done.wait (!%p3041_p8), %s2550_s24, 32  }
 0xfce   : > { %3271 = vsyncadd (!%p3041_p8), %s2550_s24, 4294967264  ;;  %s39_s0 = sadd.s32 1, %s4092_s10   ;;  %s4095_s27 = sld [smem:[#allocation8_spill]] }
 0xfcf   : > { %p36_p10 = scmp.ge.s32.totalorder %s39_s0, 6   ;;  %s4096_s3 = sld [smem:[#allocation9_spill]] }
 0xfd0   : > { %s4097_s7 = sld [smem:[#allocation19_spill]]  ;;  %s4098_s28 = sld [smem:[#allocation12_spill]] }
 0xfd1   : > { %s4099_s8 = sld [smem:[#allocation13_spill]]  ;;  %s4100_s4 = sld [smem:[#allocation15_spill]] }
 0xfd2   : > { %s4101_s29 = sld [smem:[#allocation17_spill]]  ;;  %38 = sbr.rel (!%p36_p10) target bundleno = 24 (0x18), region = 215 }
 0xfd9   :  { %2555 = vsyncpa [#allocation5], 1 }
 0xfda   :  { %2557 = vsyncpa [#allocation5 + $0x1], 1 }

</bundles_post_ra>
